<compile_context>
chip_gen: v5e
topology: v5e:2x2
jax: 0.10.0
libtpu: 0.0.40
codegen_flags: <defaults>
</compile_context>

<pallas_src>
import jax
import jax.numpy as jnp
from jax.experimental import pallas as pl
from jax.experimental.pallas import tpu as pltpu


# --------------------------------------------------------------------------- helpers

def _round_up(a, b):
    return (a + b - 1) // b * b


def _vmem_limit_bytes():
    phys = 64 << 20  # conservative default: v7x per-TensorCore VMEM
    try:
        info = pltpu.get_tpu_info()
        phys = int(getattr(info, "vmem_capacity_bytes", phys)) or phys
    except Exception:
        pass
    # leave headroom for compiler-internal scratch / double buffers
    return max(32 << 20, min(phys * 3 // 4, 110 << 20))


def _single_buffered_spec(block_shape, index_map):
    """Full-array-resident block: constant index_map, single-buffered if supported."""
    try:
        return pl.BlockSpec(block_shape, index_map, pipeline_mode=pl.Buffered(1))
    except (TypeError, AttributeError):
        return pl.BlockSpec(block_shape, index_map)


# --------------------------------------------------------------------------- in-kernel math

def _erf_f32(x):
    # Rational approximation of erf for f32 (same coefficient family XLA uses),
    # reproducing exact (erf-based) nn.GELU semantics. The divide is pushed to the
    # EUP slot via the approximate reciprocal (free alongside the MXU / VALU work).
    ka = (-2.72614225801306e-10, 2.77068142495902e-08, -2.10102402082508e-06,
          -5.69250639462346e-05, -7.34990630326855e-04, -2.954600054904e-03,
          -1.60960333262415e-02)
    kb = (-1.45660718464996e-05, -2.13374055278905e-04, -1.68282697438203e-03,
          -7.37332916720468e-03, -1.42647390514189e-02)
    x = jnp.clip(x, -4.0, 4.0)
    x2 = x * x
    p = jnp.full_like(x, ka[0])
    for c in ka[1:]:
        p = p * x2 + c
    p = p * x
    q = jnp.full_like(x, kb[0])
    for c in kb[1:]:
        q = q * x2 + c
    return p * pl.reciprocal(q, approx=True)


def _gelu_exact(x):
    # nn.GELU() default: 0.5 * x * (1 + erf(x / sqrt(2)))
    return 0.5 * x * (1.0 + _erf_f32(x * 0.7071067811865476))


# --------------------------------------------------------------------------- kernels

def _mlp_kernel_resident(x_ref, w1_ref, b1_ref, w2_ref, b2_ref, o_ref):
    """Full-weight-resident path: o = gelu(x @ W1 + b1) @ W2 + b2, one row tile per step."""
    x = x_ref[...]
    if x.dtype != jnp.bfloat16:
        x = x.astype(jnp.bfloat16)
    h = jnp.dot(x, w1_ref[...], preferred_element_type=jnp.float32) + b1_ref[...]
    h = _gelu_exact(h)
    o_ref[...] = (jnp.dot(h.astype(jnp.bfloat16), w2_ref[...],
                          preferred_element_type=jnp.float32)
                  + b2_ref[...]).astype(o_ref.dtype)


def _mlp_kernel_streamed(x_ref, w1_ref, b1_ref, w2_ref, b2_ref, o_ref):
    """Hidden-dim-streamed path: accumulate gelu(x @ W1[:, jh] + b1[jh]) @ W2[jh, :]
    directly into the (VMEM-resident) f32 output block."""
    jh = pl.program_id(1)
    nh = pl.num_programs(1)

    x = x_ref[...]
    if x.dtype != jnp.bfloat16:
        x = x.astype(jnp.bfloat16)
    h = jnp.dot(x, w1_ref[...], preferred_element_type=jnp.float32) + b1_ref[...]
    h = _gelu_exact(h)
    part = jnp.dot(h.astype(jnp.bfloat16), w2_ref[...],
                   preferred_element_type=jnp.float32)

    @pl.when(jh == 0)
    def _():
        o_ref[...] = part.astype(o_ref.dtype)        # assign (no zero-fill pass)

    @pl.when(jh != 0)
    def _():
        o_ref[...] = (o_ref[...] + part).astype(o_ref.dtype)

    @pl.when(jh == nh - 1)
    def _():
        o_ref[...] = (o_ref[...] + b2_ref[...]).astype(o_ref.dtype)


# --------------------------------------------------------------------------- wrapper

def mlp_forward(x, w1, b1, w2, b2, *, tm=256, th=None, force_stream=False):
    """Fused MLP forward: gelu(x @ w1 + b1) @ w2 + b2 (dropout = identity in eval).

    x: (..., C); w1: (C, H); b1: (H,); w2: (H, Cout); b2: (Cout,). Returns f32 (..., Cout).
    """
    *lead, C = x.shape
    H = w1.shape[1]
    Cout = w2.shape[1]

    x2 = x.reshape(-1, C)
    M = x2.shape[0]
    x_bytes = x2.dtype.itemsize

    # ---- row tile: large to amortize grid-step overhead and fill the MXU, but keep
    # at least two row tiles so both v7x TensorCores get work on small M.
    tm = max(8, min(int(tm), _round_up(M, 8)))
    if M > 8:
        tm = min(tm, max(8, _round_up(pl.cdiv(M, 2), 8)))
    tm = _round_up(tm, 8)
    m_tiles = pl.cdiv(M, tm)
    M_pad = m_tiles * tm
    if M_pad != M:
        x2 = jnp.pad(x2, ((0, M_pad - M), (0, 0)))

    # bf16 weights: halves weight DMA bytes and feeds the MXU bf16 path.
    w1b = w1.astype(jnp.bfloat16)
    w2b = w2.astype(jnp.bfloat16)
    b1r = b1.reshape(1, H).astype(jnp.float32)
    b2r = b2.reshape(1, Cout).astype(jnp.float32)

    vmem_limit = _vmem_limit_bytes()
    budget = int(vmem_limit * 0.8)

    # Can the whole bf16 weight set live in VMEM? (conservative: assume the pipeline
    # double-allocates weight blocks even though single-buffering is requested, and
    # budget an f32 (tm, H) intermediate for fc1/GELU temporaries.)
    resident_bytes = (
        2 * 2 * (C * H + H * Cout)      # bf16 W1 + W2, worst-case 2 buffers
        + 2 * 4 * (H + Cout)            # f32 biases
        + 2 * tm * C * x_bytes          # x row tile, double-buffered
        + 2 * tm * Cout * 4             # out row tile, double-buffered
        + 2 * tm * H * 4                # fc1/GELU intermediate + temps
    )
    use_resident = (not force_stream) and resident_bytes <= budget

    if use_resident:
        out = pl.pallas_call(
            _mlp_kernel_resident,
            out_shape=jax.ShapeDtypeStruct((M_pad, Cout), jnp.float32),
            grid_spec=pltpu.PrefetchScalarGridSpec(
                num_scalar_prefetch=0,
                grid=(m_tiles,),
                in_specs=[
                    pl.BlockSpec((tm, C), lambda i: (i, 0)),              # x rows
                    _single_buffered_spec((C, H), lambda i: (0, 0)),      # W1 (resident)
                    _single_buffered_spec((1, H), lambda i: (0, 0)),      # b1
                    _single_buffered_spec((H, Cout), lambda i: (0, 0)),   # W2 (resident)
                    _single_buffered_spec((1, Cout), lambda i: (0, 0)),   # b2
                ],
                out_specs=pl.BlockSpec((tm, Cout), lambda i: (i, 0)),
            ),
            compiler_params=pltpu.CompilerParams(
                dimension_semantics=("parallel",),
                vmem_limit_bytes=vmem_limit,
            ),
        )(x2, w1b, b1r, w2b, b2r)
    else:
        # ---- stream the hidden dimension; pad H to a multiple of 128 (zero-padded
        # hidden columns contribute exactly 0: gelu(0)=0 and W2 pad rows are 0).
        H_pad = _round_up(H, 128)
        if H_pad != H:
            w1b = jnp.pad(w1b, ((0, 0), (0, H_pad - H)))
            b1r = jnp.pad(b1r, ((0, 0), (0, H_pad - H)))
            w2b = jnp.pad(w2b, ((0, H_pad - H), (0, 0)))

        def step_bytes(t):
            return (2 * 2 * (C * t + t * Cout)   # bf16 W1/W2 hidden tiles, double-buffered
                    + 2 * 4 * t                  # b1 tile
                    + 2 * tm * C * x_bytes       # x row tile
                    + 2 * tm * Cout * 4          # out row tile
                    + 2 * 4 * Cout               # b2
                    + 2 * tm * t * 4)            # fc1/GELU intermediate + temps

        divisors = [t for t in range(128, H_pad + 1, 128) if H_pad % t == 0]
        if th is not None and int(th) in divisors:
            th_sel = int(th)
        else:
            th_sel = divisors[0]
            for t in divisors:
                if step_bytes(t) <= budget:
                    th_sel = t
        h_tiles = H_pad // th_sel

        out = pl.pallas_call(
            _mlp_kernel_streamed,
            out_shape=jax.ShapeDtypeStruct((M_pad, Cout), jnp.float32),
            grid_spec=pltpu.PrefetchScalarGridSpec(
                num_scalar_prefetch=0,
                grid=(m_tiles, h_tiles),
                in_specs=[
                    pl.BlockSpec((tm, C), lambda i, j: (i, 0)),           # x rows (resident over j)
                    pl.BlockSpec((C, th_sel), lambda i, j: (0, j)),       # W1 hidden tile
                    pl.BlockSpec((1, th_sel), lambda i, j: (0, j)),       # b1 hidden tile
                    pl.BlockSpec((th_sel, Cout), lambda i, j: (j, 0)),    # W2 hidden tile
                    pl.BlockSpec((1, Cout), lambda i, j: (0, 0)),         # b2
                ],
                out_specs=pl.BlockSpec((tm, Cout), lambda i, j: (i, 0)),
            ),
            compiler_params=pltpu.CompilerParams(
                dimension_semantics=("parallel", "arbitrary"),
                vmem_limit_bytes=vmem_limit,
            ),
        )(x2, w1b, b1r, w2b, b2r)

    return out[:M].reshape(*lead, Cout)


# --------------------------------------------------------------------------- pure-JAX references

def mlp_ref_f32(x, w1, b1, w2, b2):
    # Exact f32 semantics of the PyTorch module (Dropout identity in eval).
    h = jax.nn.gelu(x @ w1 + b1, approximate=False)
    return h @ w2 + b2


def mlp_ref_bf16(x, w1, b1, w2, b2):
    # Same bf16-operand / f32-accumulate matmul numerics as the kernel (tight check).
    h = jnp.dot(x.astype(jnp.bfloat16), w1.astype(jnp.bfloat16),
                preferred_element_type=jnp.float32) + b1
    h = jax.nn.gelu(h, approximate=False)
    return jnp.dot(h.astype(jnp.bfloat16), w2.astype(jnp.bfloat16),
                   preferred_element_type=jnp.float32) + b2


# --------------------------------------------------------------------------- main

if __name__ == "__main__":
    # Small ViT-style MLP config: tokens (B, N, C), hidden = 4 * C.
    B, N, C = 2, 64, 128
    hidden = 4 * C                      # 512
    out_features = C                    # MLP default: out_features = in_features

    key = jax.random.PRNGKey(0)
    kx, k1, k2, k3, k4 = jax.random.split(key, 5)
    x = jax.random.normal(kx, (B, N, C), jnp.float32)
    w1 = (0.02 * jax.random.normal(k1, (C, hidden))).astype(jnp.float32)
    b1 = (0.02 * jax.random.normal(k2, (hidden,))).astype(jnp.float32)
    w2 = (0.02 * jax.random.normal(k3, (hidden, out_features))).astype(jnp.float32)
    b2 = (0.02 * jax.random.normal(k4, (out_features,))).astype(jnp.float32)

    # Default path (full-weight-resident at this size).
    out = jax.block_until_ready(mlp_forward(x, w1, b1, w2, b2))
    assert out.shape == (B, N, out_features)
    assert bool(jnp.all(jnp.isfinite(out)))

    # Also exercise the hidden-dim-streamed path (forced) so both kernels are validated.
    out_s = jax.block_until_ready(mlp_forward(x, w1, b1, w2, b2,
                                              force_stream=True, th=128))
    assert out_s.shape == (B, N, out_features)
    assert bool(jnp.all(jnp.isfinite(out_s)))

    ref_b = mlp_ref_bf16(x, w1, b1, w2, b2)   # same matmul numerics as the kernel
    ref_f = mlp_ref_f32(x, w1, b1, w2, b2)    # exact f32 module semantics
    for o in (out, out_s):
        assert float(jnp.max(jnp.abs(o - ref_b))) < 5e-3, "mismatch vs bf16 reference"
        assert float(jnp.max(jnp.abs(o - ref_f))) < 2e-2, "mismatch vs f32 reference"

    print("KERNEL_OK")
</pallas_src>

<mosaic_0001>
module attributes {stable_mosaic.version = 11 : i64} {
  func.func @_mlp_kernel_resident(%arg0: i32, %arg1: memref<64x128xf32, #tpu.memory_space<vmem>>, %arg2: memref<128x512xbf16, #tpu.memory_space<vmem>>, %arg3: memref<1x512xf32, #tpu.memory_space<vmem>>, %arg4: memref<512x128xbf16, #tpu.memory_space<vmem>>, %arg5: memref<1x128xf32, #tpu.memory_space<vmem>>, %arg6: memref<64x128xf32, #tpu.memory_space<vmem>>) attributes {dimension_semantics = [#tpu.dimension_semantics<parallel>], iteration_bounds = array<i64: 2>, scalar_prefetch = 0 : i64, scratch_operands = 0 : i64, tpu.core_type = #tpu.core_type<tc>, window_params = [{transform_indices = @transform_0, window_bounds = array<i64: 64, 128>}, {pipeline_mode = #tpu.pipeline_mode<synchronous>, transform_indices = @transform_1, window_bounds = array<i64: 128, 512>}, {pipeline_mode = #tpu.pipeline_mode<synchronous>, transform_indices = @transform_2, window_bounds = array<i64: 1, 512>}, {pipeline_mode = #tpu.pipeline_mode<synchronous>, transform_indices = @transform_3, window_bounds = array<i64: 512, 128>}, {pipeline_mode = #tpu.pipeline_mode<synchronous>, transform_indices = @transform_4, window_bounds = array<i64: 1, 128>}, {transform_indices = @transform_5, window_bounds = array<i64: 64, 128>}]} {
    %c0 = arith.constant 0 : index
    %c0_0 = arith.constant 0 : index
    %0 = vector.load %arg1[%c0, %c0_0] : memref<64x128xf32, #tpu.memory_space<vmem>>, vector<64x128xf32>
    %1 = arith.truncf %0 : vector<64x128xf32> to vector<64x128xbf16>
    %c0_1 = arith.constant 0 : index
    %c0_2 = arith.constant 0 : index
    %2 = vector.load %arg2[%c0_1, %c0_2] : memref<128x512xbf16, #tpu.memory_space<vmem>>, vector<128x512xbf16>
    %cst = arith.constant dense<0.000000e+00> : vector<64x512xf32>
    %3 = tpu.matmul %1, %2, %cst {dimension_numbers = #tpu.dot_dimension_numbers<[1], [0], [0], [1], [0, 0, 1, 1], [], []>} : vector<64x128xbf16>, vector<128x512xbf16>, vector<64x512xf32> -> vector<64x512xf32>
    %c0_3 = arith.constant 0 : index
    %c0_4 = arith.constant 0 : index
    %4 = vector.load %arg3[%c0_3, %c0_4] : memref<1x512xf32, #tpu.memory_space<vmem>>, vector<1x512xf32>
    %5 = vector.broadcast %4 : vector<1x512xf32> to vector<64x512xf32>
    %6 = arith.addf %3, %5 : vector<64x512xf32>
    %cst_5 = arith.constant 5.000000e-01 : f32
    %7 = vector.broadcast %cst_5 : f32 to vector<64x512xf32>
    %8 = arith.mulf %7, %6 : vector<64x512xf32>
    %cst_6 = arith.constant 0.707106769 : f32
    %9 = vector.broadcast %cst_6 : f32 to vector<64x512xf32>
    %10 = arith.mulf %6, %9 : vector<64x512xf32>
    %cst_7 = arith.constant -4.000000e+00 : f32
    %cst_8 = arith.constant 4.000000e+00 : f32
    %11 = vector.broadcast %cst_7 : f32 to vector<64x512xf32>
    %12 = arith.maximumf %11, %10 : vector<64x512xf32>
    %13 = vector.broadcast %cst_8 : f32 to vector<64x512xf32>
    %14 = arith.minimumf %13, %12 : vector<64x512xf32>
    %15 = arith.mulf %14, %14 : vector<64x512xf32>
    %cst_9 = arith.constant -2.72614237E-10 : f32
    %16 = vector.broadcast %cst_9 : f32 to vector<64x512xf32>
    %17 = arith.mulf %16, %15 : vector<64x512xf32>
    %cst_10 = arith.constant 2.77068146E-8 : f32
    %18 = vector.broadcast %cst_10 : f32 to vector<64x512xf32>
    %19 = arith.addf %17, %18 : vector<64x512xf32>
    %20 = arith.mulf %19, %15 : vector<64x512xf32>
    %cst_11 = arith.constant -2.10102394E-6 : f32
    %21 = vector.broadcast %cst_11 : f32 to vector<64x512xf32>
    %22 = arith.addf %20, %21 : vector<64x512xf32>
    %23 = arith.mulf %22, %15 : vector<64x512xf32>
    %cst_12 = arith.constant -5.69250624E-5 : f32
    %24 = vector.broadcast %cst_12 : f32 to vector<64x512xf32>
    %25 = arith.addf %23, %24 : vector<64x512xf32>
    %26 = arith.mulf %25, %15 : vector<64x512xf32>
    %cst_13 = arith.constant -7.34990637E-4 : f32
    %27 = vector.broadcast %cst_13 : f32 to vector<64x512xf32>
    %28 = arith.addf %26, %27 : vector<64x512xf32>
    %29 = arith.mulf %28, %15 : vector<64x512xf32>
    %cst_14 = arith.constant -0.00295460015 : f32
    %30 = vector.broadcast %cst_14 : f32 to vector<64x512xf32>
    %31 = arith.addf %29, %30 : vector<64x512xf32>
    %32 = arith.mulf %31, %15 : vector<64x512xf32>
    %cst_15 = arith.constant -0.0160960332 : f32
    %33 = vector.broadcast %cst_15 : f32 to vector<64x512xf32>
    %34 = arith.addf %32, %33 : vector<64x512xf32>
    %35 = arith.mulf %34, %14 : vector<64x512xf32>
    %cst_16 = arith.constant -1.45660715E-5 : f32
    %36 = vector.broadcast %cst_16 : f32 to vector<64x512xf32>
    %37 = arith.mulf %36, %15 : vector<64x512xf32>
    %cst_17 = arith.constant -2.13374049E-4 : f32
    %38 = vector.broadcast %cst_17 : f32 to vector<64x512xf32>
    %39 = arith.addf %37, %38 : vector<64x512xf32>
    %40 = arith.mulf %39, %15 : vector<64x512xf32>
    %cst_18 = arith.constant -0.00168282702 : f32
    %41 = vector.broadcast %cst_18 : f32 to vector<64x512xf32>
    %42 = arith.addf %40, %41 : vector<64x512xf32>
    %43 = arith.mulf %42, %15 : vector<64x512xf32>
    %cst_19 = arith.constant -0.00737332925 : f32
    %44 = vector.broadcast %cst_19 : f32 to vector<64x512xf32>
    %45 = arith.addf %43, %44 : vector<64x512xf32>
    %46 = arith.mulf %45, %15 : vector<64x512xf32>
    %cst_20 = arith.constant -0.0142647391 : f32
    %47 = vector.broadcast %cst_20 : f32 to vector<64x512xf32>
    %48 = arith.addf %46, %47 : vector<64x512xf32>
    %49 = tpu.reciprocal %48 {approx = true} : vector<64x512xf32> -> vector<64x512xf32>
    %50 = arith.mulf %35, %49 : vector<64x512xf32>
    %cst_21 = arith.constant 1.000000e+00 : f32
    %51 = vector.broadcast %cst_21 : f32 to vector<64x512xf32>
    %52 = arith.addf %51, %50 : vector<64x512xf32>
    %53 = arith.mulf %8, %52 : vector<64x512xf32>
    %54 = arith.truncf %53 : vector<64x512xf32> to vector<64x512xbf16>
    %c0_22 = arith.constant 0 : index
    %c0_23 = arith.constant 0 : index
    %55 = vector.load %arg4[%c0_22, %c0_23] : memref<512x128xbf16, #tpu.memory_space<vmem>>, vector<512x128xbf16>
    %cst_24 = arith.constant dense<0.000000e+00> : vector<64x128xf32>
    %56 = tpu.matmul %54, %55, %cst_24 {dimension_numbers = #tpu.dot_dimension_numbers<[1], [0], [0], [1], [0, 0, 1, 1], [], []>} : vector<64x512xbf16>, vector<512x128xbf16>, vector<64x128xf32> -> vector<64x128xf32>
    %c0_25 = arith.constant 0 : index
    %c0_26 = arith.constant 0 : index
    %57 = vector.load %arg5[%c0_25, %c0_26] : memref<1x128xf32, #tpu.memory_space<vmem>>, vector<1x128xf32>
    %58 = vector.broadcast %57 : vector<1x128xf32> to vector<64x128xf32>
    %59 = arith.addf %56, %58 : vector<64x128xf32>
    %c0_27 = arith.constant 0 : index
    %c0_28 = arith.constant 0 : index
    %60 = vector.load %arg6[%c0_27, %c0_28] : memref<64x128xf32, #tpu.memory_space<vmem>>, vector<64x128xf32>
    tpu.vector_store %arg6[%c0_27, %c0_28], %59 {strides = array<i32>} : memref<64x128xf32, #tpu.memory_space<vmem>>, vector<64x128xf32>,
    return
  }
  func.func @transform_0(%arg0: i32) -> (i32, i32) {
    %c0_i32 = arith.constant 0 : i32
    %c0_i32_0 = arith.constant 0 : i32
    return %arg0, %c0_i32 : i32, i32
  }
  func.func @transform_1(%arg0: i32) -> (i32, i32) {
    %c0_i32 = arith.constant 0 : i32
    %c0_i32_0 = arith.constant 0 : i32
    %c0_i32_1 = arith.constant 0 : i32
    return %c0_i32, %c0_i32_0 : i32, i32
  }
  func.func @transform_2(%arg0: i32) -> (i32, i32) {
    %c0_i32 = arith.constant 0 : i32
    %c0_i32_0 = arith.constant 0 : i32
    %c0_i32_1 = arith.constant 0 : i32
    return %c0_i32, %c0_i32_0 : i32, i32
  }
  func.func @transform_3(%arg0: i32) -> (i32, i32) {
    %c0_i32 = arith.constant 0 : i32
    %c0_i32_0 = arith.constant 0 : i32
    %c0_i32_1 = arith.constant 0 : i32
    return %c0_i32, %c0_i32_0 : i32, i32
  }
  func.func @transform_4(%arg0: i32) -> (i32, i32) {
    %c0_i32 = arith.constant 0 : i32
    %c0_i32_0 = arith.constant 0 : i32
    %c0_i32_1 = arith.constant 0 : i32
    return %c0_i32, %c0_i32_0 : i32, i32
  }
  func.func @transform_5(%arg0: i32) -> (i32, i32) {
    %c0_i32 = arith.constant 0 : i32
    %c0_i32_0 = arith.constant 0 : i32
    return %arg0, %c0_i32 : i32, i32
  }
}

</mosaic_0001>

<bundles_post_ra>
// kernel: tpu_custom_call.1
= control target key start
LH: loop header
LB: loop body
LE: loop exit
PB: predicated region body
PF: predicated region fallthrough
CT: control target
= control target key end

     0   :  { %10 = vsyncpa [#allocation3], 0  ;;  %s3947_s0 = inlined_call_operand.hbm [shape: f32[128,128], index: 0, kind: input, shape index: {}]   ;;  %s3948_s1 = inlined_call_operand.hbm [shape: bf16[128,512], index: 1, kind: input, shape index: {}]   ;;  %s3949_s2 = inlined_call_operand.hbm [shape: f32[1,512], index: 2, kind: input, shape index: {}]   ;;  %s3950_s3 = inlined_call_operand.hbm [shape: bf16[512,128], index: 3, kind: input, shape index: {}]   ;;  %s3951_s4 = inlined_call_operand.vmem [shape: f32[1,128], index: 4, kind: input, shape index: {}]   ;;  %s3952_s5 = inlined_call_operand.hbm [shape: f32[128,128], index: 5, kind: output, shape index: {}]  }
   0x1   :  { %12 = vsyncpa [#allocation3 + $0x1], 0 }
   0x2   :  { %13 = vsyncpa [#allocation6], 0 }
   0x3   :  { %14 = vsyncpa [#allocation9], 0 }
   0x4   :  { %15 = vsyncpa [#allocation4], 0 }
   0x5   :  { %17 = vsyncpa [#allocation4 + $0x1], 0  ;;  %s2864_s18 = smov 0   ;;  %s2866_s19 = smov 0  }
   0x6   :  { %s2868_s20 = smov 0   ;;  %s2870_s21 = smov 0  }
   0x7 LB: > { %s2885_s22 = sadd.s32 4294967295, %s2821_s21   ;;  %s2103_s23 = sadd.s32 4294967294, %s2821_s21   ;;  %s2821_s21 = sphi %s2870_s21, %s4054_s21   ;;  %s2817_s20 = sphi %s2868_s20, %s4053_s20   ;;  %s2813_s19 = sphi %s2866_s19, %s4052_s19   ;;  %s2809_s18 = sphi %s2864_s18, %s4051_s18  }
   0x8   : > { %p43_p0 = scmp.ne.s32.totalorder %s2813_s19, %s2809_s18  ;;  %p44_p1 = scmp.eq.s32.totalorder %s2885_s22, 0 }
   0x9   : > { %p151_p2 = scmp.eq.s32.totalorder %s2885_s22, 1  ;;  %p157_p3 = scmp.eq.s32.totalorder %s2103_s23, 1 }
   0xa   : > { %p2894_p4 = por %p44_p1, %p43_p0  ;;  %p2104_p5 = scmp.ge.s32.totalorder %s2821_s21, 1 }
   0xb   : > { %p2899_p6 = por %p157_p3, %p43_p0  ;;  %p164_p7 = scmp.lt.s32.totalorder %s2821_s21, 3 }
   0xc   : > { %s175_s28 = sshll.u32 %s3948_s1, 4  ;;  %s2823_s30 = smov [#allocation5]   ;;  %s176_s28 = int_to_ptr.hbm [resolvable:$true] %s175_s28 }
   0xd   : > { %p2907_p8 = pnand %p2104_p5, %p164_p7  ;;  %s177_s6 = sshll.u32 %s2823_s30, 4  ;;  %s178_s6 = int_to_ptr.vmem [resolvable:$true] %s177_s6 }
   0xe   : > { %s190_s10 = sshll.u32 %s3949_s2, 4  ;;  %s2824_s11 = smov 256   ;;  %s191_s10 = int_to_ptr.hbm [resolvable:$true] %s190_s10 }
   0xf   : > { %p2493_p9 = pneg %p2907_p8  ;;  %s2825_s12 = smov 16  }
  0x10   : > { %s2826_s13 = smov [#allocation7]   ;;  %s201_s17 = sshll.u32 %s3950_s3, 4  ;;  %s202_s17 = int_to_ptr.hbm [resolvable:$true] %s201_s17 }
  0x11   : > { %p2915_p10 = pnand %p2493_p9, %p44_p1  ;;  %s192_s14 = sshll.u32 %s2826_s13, 4  ;;  %s193_s14 = int_to_ptr.vmem [resolvable:$true] %s192_s14 }
  0x12   : > { %s2827_s23 = smov [#allocation8]   ;;  %s2828_s27 = smov 64  }
  0x13   : > { %2496 = dma.hbm_to_vmem [thread:$0]  (!%p2915_p10), %s176_s28, 4096, %s178_s6, [#allocation6], %s2824_s11, %s2824_s11, %s2825_s12  }
  0x14   : > { %2499 = dma.hbm_to_vmem [thread:$0]  (!%p2915_p10), %s191_s10, 64, %s193_s14, [#allocation6]  }
  0x15   : > { %s203_s26 = sshll.u32 %s2827_s23, 4  ;;  %s2829_s28 = smov 4   ;;  %s204_s26 = int_to_ptr.vmem [resolvable:$true] %s203_s26 }
  0x16   : > { %2502 = dma.hbm_to_vmem [thread:$0]  (!%p2915_p10), %s202_s17, 4096, %s204_s26, [#allocation9], %s2828_s27, %s2828_s27, %s2829_s28  }
  0x17   : > { %s2933_s30 = sadd.s32 1, %s2821_s21   ;;  %s30_s8 = sadd.s32 1, %s2817_s20 }
  0x18   : > { %s27_s6 = ssub.s32 %s2821_s21, %s2933_s30  ;;  %p37_p13 = scmp.ne.s32.totalorder %s2817_s20, %s2813_s19 }
  0x19   : > { %p28_p12 = scmp.eq.s32.totalorder %s27_s6, 0  ;;  %p38_p0 = scmp.eq.s32.totalorder %s2821_s21, 0 }
  0x1a   : > { %p2514_p3 = scmp.lt.s32.totalorder %s2821_s21, 2  ;;  %p2947_p7 = por %p151_p2, %p37_p13 }
  0x1b   : > { %s2943_s9 = scalar_select %p28_p12, %s2817_s20, %s30_s8  }
  0x1c   : > { %p39_p5 = por %p38_p0, %p37_p13  ;;  %s220_s7 = sand.u32 1, %s2817_s20  }
  0x1d   : > { %s2411_s11 = sshll.u32 %s2821_s21, 6  ;;  %s2109_s12 = sshll.u32 %s220_s7, 6 }
  0x1e   : > { %s229_s15 = scalar_lea.hbm %s3947_s0, %s2411_s11  ;;  %s224_s17 = scalar_lea.vmem [#allocation2], %s2109_s12 }
  0x1f   : > { %s230_s16 = sshll.u32 %s229_s15, 4  ;;  %s232_s23 = sshll.u32 %s224_s17, 4  ;;  %s231_s16 = int_to_ptr.hbm [resolvable:$true] %s230_s16  ;;  %s233_s23 = int_to_ptr.vmem [resolvable:$true] %s232_s23 }
  0x20   : > { %p2958_p9 = pnand %p2514_p3, %p39_p5  ;;  %s221_s27 = scalar_lea.sflag [#allocation3], %s220_s7 }
  0x21   : > { %s2717_s28 = sshra.s32 %s231_s16, 4  ;;  %s2724_s12 = scalar_lea.hbm %s3947_s0, 128  ;;  %s2718_s28 = int_to_ptr.hbm [resolvable:$true] %s2717_s28 }
  0x22   : > { %s2719_s6 = scalar_lea.hbm %s2718_s28, 64  ;;  %p2721_p10 = pneg %p2958_p9 }
  0x23   : > { %p2720_p2 = scmp.ne.s32.totalorder %s2718_s28, %s2719_s6  ;;  %p2725_p0 = scmp.lt.s32.totalorder %s2718_s28, %s3947_s0 }
  0x24   : > { %p2726_p3 = scmp.lt.s32.totalorder %s2724_s12, %s2719_s6 }
  0x25   : > { %p2722_p12 = pnand %p2721_p10, %p2720_p2 }
  0x26   : > { %p2727_p5 = por %p2726_p3, %p2725_p0 }
  0x27   : > { %p2723_p13 = pneg %p2722_p12 }
  0x29   : > { %p2728_p11 = pnand %p2727_p5, %p2723_p13 }
  0x2b   : > { %2731 = shalt.err (!%p2728_p11)
}
  0x2c   : > { %s2830_s7 = smov 128   ;;  %s2831_s15 = smov 8  }
  0x2d   : > { %2506 = dma.hbm_to_vmem [thread:$0]  (!%p2958_p9), %s231_s16, 1024, %s233_s23, %s221_s27, %s2830_s7, %s2830_s7, %s2831_s15  }
  0x2e   : > { %244 = sbr.rel (%p2907_p8) target bundleno = 628 (0x274), region = 40 }
  0x33   : > { %s2975_s17 = sand.u32 1, %s2813_s19  }
  0x34   : > { %s2113_s28 = sshll.u32 %s2975_s17, 6  ;;  %s247_s6 = scalar_lea.sflag [#allocation3], %s2975_s17 }
  0x35   : > { %s2981_s8 = scalar_lea.vmem [#allocation2], %s2113_s28 }
  0x36   : > { %2792 = dma.done.wait (%p2894_p4), %s247_s6, 1024  }
  0x37   : > { %2794 = vsyncadd (%p2894_p4), %s247_s6, 4294966272 }
  0x38   : > { %2796 = dma.done.wait (%p44_p1), [#allocation6], 4160  }
  0x39   : > { %2798 = vsyncadd (%p44_p1), [#allocation6], 4294963136 }
  0x3a   : > { %2800 = dma.done.wait (%p44_p1), [#allocation9], 4096  }
  0x3b   : > { %2802 = vsyncadd (%p44_p1), [#allocation9], 4294963200  ;;  %v2232_v0 = vld [vmem:[#allocation5 + $0xe0] sm:$0xf]  ;;  %v2442_v1 = vld [vmem:[#allocation5 + $0xec] sm:$0xf0] }
  0x3c   : > { %v2440_v2 = vld [vmem:[#allocation5 + $0xe4] sm:$0xf]  ;;  %v2233_v3 = vor.u32 %v2442_v1, %v2232_v0  ;;  %v2234_v4 = vld [vmem:[#allocation5 + $0xf0] sm:$0xf0]  ;;  %v2240_v5 = vld [vmem:[#allocation5 + $0xe8] sm:$0xf] }
  0x3d   : > { %v2443_v6 = vld [vmem:[#allocation5 + $0xf4] sm:$0xf0]  ;;  %v2237_v7 = vor.u32 %v2440_v2, %v2234_v4  ;;  %v2441_v9 = vld [vmem:[#allocation5 + $0xec] sm:$0xf]  ;;  %v2242_v10 = vld [vmem:[#allocation5 + $0xf8] sm:$0xf0] }
  0x3e   : > { %v2241_v8 = vor.u32 %v2443_v6, %v2240_v5  ;;  %v2216_v11 = vld [vmem:[#allocation5 + $0xc0] sm:$0xf]  ;;  %509 = vmatpush.bf16.msra.mxu0 %v2233_v3  ;;  %v2245_v12 = vor.u32 %v2441_v9, %v2242_v10  ;;  %v2438_v13 = vld [vmem:[#allocation5 + $0xcc] sm:$0xf0]  ;;  %v2436_v14 = vld [vmem:[#allocation5 + $0xc4] sm:$0xf] }
  0x3f   : > { %v2218_v15 = vld [vmem:[#allocation5 + $0xd0] sm:$0xf0]  ;;  %538 = vmatpush.bf16.msra.mxu1 %v2237_v7  ;;  %v2217_v16 = vor.u32 %v2438_v13, %v2216_v11  ;;  %v2224_v18 = vld [vmem:[#allocation5 + $0xc8] sm:$0xf]  ;;  %v2439_v19 = vld [vmem:[#allocation5 + $0xd4] sm:$0xf0] }
  0x40   : > { %567 = vmatpush.bf16.msra.mxu2 %v2241_v8  ;;  %v2221_v17 = vor.u32 %v2436_v14, %v2218_v15  ;;  %v2437_v20 = vld [vmem:[#allocation5 + $0xcc] sm:$0xf]  ;;  %596 = vmatpush.bf16.msra.mxu3 %v2245_v12  ;;  %v2225_v21 = vor.u32 %v2439_v19, %v2224_v18  ;;  %v2226_v22 = vld [vmem:[#allocation5 + $0xd8] sm:$0xf0]  ;;  %v2200_v23 = vld [vmem:[#allocation5 + $0xa0] sm:$0xf] }
  0x41   : > { %v2434_v24 = vld [vmem:[#allocation5 + $0xac] sm:$0xf0]  ;;  %v2229_v25 = vor.u32 %v2437_v20, %v2226_v22  ;;  %v2432_v26 = vld [vmem:[#allocation5 + $0xa4] sm:$0xf]  ;;  %v2202_v27 = vld [vmem:[#allocation5 + $0xb0] sm:$0xf0] }
  0x42   : > { %v2208_v28 = vld [vmem:[#allocation5 + $0xa8] sm:$0xf]  ;;  %510 = vmatpush.bf16.msra.mxu0 %v2217_v16  ;;  %v2201_v29 = vor.u32 %v2434_v24, %v2200_v23  ;;  %v2435_v30 = vld [vmem:[#allocation5 + $0xb4] sm:$0xf0]  ;;  %v2433_v31 = vld [vmem:[#allocation5 + $0xac] sm:$0xf]  ;;  %v2205_v33 = vor.u32 %v2432_v26, %v2202_v27 }
  0x43   : > { %v2210_v32 = vld [vmem:[#allocation5 + $0xb8] sm:$0xf0]  ;;  %539 = vmatpush.bf16.msra.mxu1 %v2221_v17  ;;  %v2209_v34 = vor.u32 %v2435_v30, %v2208_v28  ;;  %v2184_v35 = vld [vmem:[#allocation5 + $0x80] sm:$0xf]  ;;  %v2430_v36 = vld [vmem:[#allocation5 + $0x8c] sm:$0xf0] }
  0x44   : > { %568 = vmatpush.bf16.msra.mxu2 %v2225_v21  ;;  %v2428_v37 = vld [vmem:[#allocation5 + $0x84] sm:$0xf]  ;;  %597 = vmatpush.bf16.msra.mxu3 %v2229_v25  ;;  %v2213_v38 = vor.u32 %v2433_v31, %v2210_v32  ;;  %v2186_v39 = vld [vmem:[#allocation5 + $0x90] sm:$0xf0]  ;;  %v2192_v40 = vld [vmem:[#allocation5 + $0x88] sm:$0xf]  ;;  %v2185_v44 = vor.u32 %v2430_v36, %v2184_v35 }
  0x45   : > { %v2431_v41 = vld [vmem:[#allocation5 + $0x94] sm:$0xf0]  ;;  %v2429_v42 = vld [vmem:[#allocation5 + $0x8c] sm:$0xf]  ;;  %v2194_v43 = vld [vmem:[#allocation5 + $0x98] sm:$0xf0]  ;;  %v2189_v45 = vor.u32 %v2428_v37, %v2186_v39 }
  0x46   : > { %511 = vmatpush.bf16.msra.mxu0 %v2201_v29  ;;  %v2193_v46 = vor.u32 %v2431_v41, %v2192_v40  ;;  %v2168_v47 = vld [vmem:[#allocation5 + $0x60] sm:$0xf]  ;;  %v2426_v48 = vld [vmem:[#allocation5 + $0x6c] sm:$0xf0]  ;;  %v2424_v49 = vld [vmem:[#allocation5 + $0x64] sm:$0xf]  ;;  %v2197_v50 = vor.u32 %v2429_v42, %v2194_v43 }
  0x47   : > { %540 = vmatpush.bf16.msra.mxu1 %v2205_v33  ;;  %v2170_v51 = vld [vmem:[#allocation5 + $0x70] sm:$0xf0]  ;;  %v2176_v52 = vld [vmem:[#allocation5 + $0x68] sm:$0xf]  ;;  %v2427_v53 = vld [vmem:[#allocation5 + $0x74] sm:$0xf0]  ;;  %v2169_v56 = vor.u32 %v2426_v48, %v2168_v47 }
  0x48   : > { %569 = vmatpush.bf16.msra.mxu2 %v2209_v34  ;;  %598 = vmatpush.bf16.msra.mxu3 %v2213_v38  ;;  %v2425_v54 = vld [vmem:[#allocation5 + $0x6c] sm:$0xf]  ;;  %v2178_v55 = vld [vmem:[#allocation5 + $0x78] sm:$0xf0]  ;;  %v2173_v57 = vor.u32 %v2424_v49, %v2170_v51  ;;  %v2177_v58 = vor.u32 %v2427_v53, %v2176_v52  ;;  %v2152_v59 = vld [vmem:[#allocation5 + $0x40] sm:$0xf] }
  0x49   : > { %v2422_v60 = vld [vmem:[#allocation5 + $0x4c] sm:$0xf0]  ;;  %v2420_v61 = vld [vmem:[#allocation5 + $0x44] sm:$0xf]  ;;  %v2181_v62 = vor.u32 %v2425_v54, %v2178_v55  ;;  %v2154_v63 = vld [vmem:[#allocation5 + $0x50] sm:$0xf0] }
  0x4a   : > { %512 = vmatpush.bf16.msra.mxu0 %v2185_v44  ;;  %v2160_v0 = vld [vmem:[#allocation5 + $0x48] sm:$0xf]  ;;  %v2423_v1 = vld [vmem:[#allocation5 + $0x54] sm:$0xf0]  ;;  %v2421_v2 = vld [vmem:[#allocation5 + $0x4c] sm:$0xf]  ;;  %v2153_v4 = vor.u32 %v2422_v60, %v2152_v59  ;;  %v2157_v5 = vor.u32 %v2420_v61, %v2154_v63 }
  0x4b   : > { %541 = vmatpush.bf16.msra.mxu1 %v2189_v45  ;;  %v2162_v3 = vld [vmem:[#allocation5 + $0x58] sm:$0xf0]  ;;  %v2161_v6 = vor.u32 %v2423_v1, %v2160_v0  ;;  %v2136_v7 = vld [vmem:[#allocation5 + $0x20] sm:$0xf]  ;;  %v2418_v8 = vld [vmem:[#allocation5 + $0x2c] sm:$0xf0] }
  0x4c   : > { %570 = vmatpush.bf16.msra.mxu2 %v2193_v46  ;;  %599 = vmatpush.bf16.msra.mxu3 %v2197_v50  ;;  %v2416_v9 = vld [vmem:[#allocation5 + $0x24] sm:$0xf]  ;;  %v2165_v10 = vor.u32 %v2421_v2, %v2162_v3  ;;  %v2138_v11 = vld [vmem:[#allocation5 + $0x30] sm:$0xf0]  ;;  %v2144_v12 = vld [vmem:[#allocation5 + $0x28] sm:$0xf]  ;;  %v2137_v16 = vor.u32 %v2418_v8, %v2136_v7 }
  0x4d   : > { %v2419_v13 = vld [vmem:[#allocation5 + $0x34] sm:$0xf0]  ;;  %v2417_v14 = vld [vmem:[#allocation5 + $0x2c] sm:$0xf]  ;;  %v2146_v15 = vld [vmem:[#allocation5 + $0x38] sm:$0xf0]  ;;  %v2141_v17 = vor.u32 %v2416_v9, %v2138_v11 }
  0x4e   : > { %513 = vmatpush.bf16.msra.mxu0 %v2169_v56  ;;  %v2145_v18 = vor.u32 %v2419_v13, %v2144_v12  ;;  %v2120_v19 = vld [vmem:[#allocation5] sm:$0xf]  ;;  %v2414_v20 = vld [vmem:[#allocation5 + $0xc] sm:$0xf0]  ;;  %v2412_v21 = vld [vmem:[#allocation5 + $0x4] sm:$0xf]  ;;  %v2149_v22 = vor.u32 %v2417_v14, %v2146_v15 }
  0x4f   : > { %542 = vmatpush.bf16.msra.mxu1 %v2173_v57  ;;  %v2122_v23 = vld [vmem:[#allocation5 + $0x10] sm:$0xf0]  ;;  %v2128_v24 = vld [vmem:[#allocation5 + $0x8] sm:$0xf]  ;;  %v2415_v25 = vld [vmem:[#allocation5 + $0x14] sm:$0xf0]  ;;  %v2121_v28 = vor.u32 %v2414_v20, %v2120_v19 }
  0x50   : > { %571 = vmatpush.bf16.msra.mxu2 %v2177_v58  ;;  %600 = vmatpush.bf16.msra.mxu3 %v2181_v62  ;;  %v2413_v26 = vld [vmem:[#allocation5 + $0xc] sm:$0xf]  ;;  %v2130_v27 = vld [vmem:[#allocation5 + $0x18] sm:$0xf0]  ;;  %v295_v29 = vld [vmem:[%s2981_s8] sm:$0xff]  ;;  %v2125_v31 = vor.u32 %v2412_v21, %v2122_v23  ;;  %v2129_v32 = vor.u32 %v2415_v25, %v2128_v24  ;;  %s3896_s16 = scalar_lea.vmem [#allocation10], %s2113_s28 }
  0x51   : > { %v296_v30 = vld [vmem:[%s2981_s8 + $0x8] sm:$0xff]  ;;  %v2133_v33 = vor.u32 %v2413_v26, %v2130_v27  ;;  %v297_v35 = vld [vmem:[%s2981_s8 + $0x10] sm:$0xff]  ;;  %v298_v36 = vld [vmem:[%s2981_s8 + $0x18] sm:$0xff]  ;;  %s2476_s23 = sshll.u32 %s2885_s22, 6  ;;  %s1998_s12 = sshll.u32 %s3896_s16, 4  ;;  %s1999_s12 = int_to_ptr.vmem [resolvable:$true] %s1998_s12 }
  0x52   : > { %514 = vmatpush.bf16.msra.mxu0 %v2153_v4  ;;  %v303_v34 = vpack.c.bf16 %v296_v30, %v295_v29  ;;  %v304_v37 = vpack.c.bf16 %v298_v36, %v297_v35  ;;  %v2467_v38 = vld [vmem:[#allocation8 + $0xb8] sm:$0xff]  ;;  %v300_v43 = vld [vmem:[%s2981_s8 + $0x28] sm:$0xff]  ;;  %v301_v45 = vld [vmem:[%s2981_s8 + $0x30] sm:$0xff]  ;;  %s1997_s11 = scalar_lea.hbm %s3952_s5, %s2476_s23  ;;  %s1986_s14 = scalar_lea.sflag [#allocation4], %s2975_s17 }
  0x53   : > { %543 = vmatpush.bf16.msra.mxu1 %v2157_v5  ;;  %v2451_v39 = vld [vmem:[#allocation8 + $0x38] sm:$0xff]  ;;  %v2450_v48 = vld [vmem:[#allocation8 + $0x30] sm:$0xff]  ;;  %s2000_s13 = sshll.u32 %s1997_s11, 4  ;;  %s2767_s6 = scalar_lea.hbm %s3952_s5, 128  ;;  %s2001_s13 = int_to_ptr.hbm [resolvable:$true] %s2000_s13 }
  0x54   : > { %572 = vmatpush.bf16.msra.mxu2 %v2161_v6  ;;  %601 = vmatpush.bf16.msra.mxu3 %v2165_v10  ;;  %v2475_v40 = vld [vmem:[#allocation8 + $0xf8] sm:$0xff]  ;;  %v2458_v49 = vld [vmem:[#allocation8 + $0x70] sm:$0xff]  ;;  %s2761_s22 = sshra.s32 %s2001_s13, 4  ;;  %s2762_s22 = int_to_ptr.hbm [resolvable:$true] %s2761_s22 }
  0x55   : > { %v2459_v41 = vld [vmem:[#allocation8 + $0x78] sm:$0xff]  ;;  %v2466_v53 = vld [vmem:[#allocation8 + $0xb0] sm:$0xff]  ;;  %s2763_s7 = scalar_lea.hbm %s2762_s22, 64  ;;  %p2768_p11 = scmp.lt.s32.totalorder %s2762_s22, %s3952_s5 }
  0x56   : > { %515 = vmatpush.bf16.msra.mxu0 %v2137_v16  ;;  %v299_v42 = vld [vmem:[%s2981_s8 + $0x20] sm:$0xff]  ;;  %v302_v46 = vld [vmem:[%s2981_s8 + $0x38] sm:$0xff]  ;;  %p2764_p1 = scmp.ne.s32.totalorder %s2762_s22, %s2763_s7  ;;  %p2769_p9 = scmp.lt.s32.totalorder %s2767_s6, %s2763_s7 }
  0x57   : > { %544 = vmatpush.bf16.msra.mxu1 %v2141_v17  ;;  %v305_v44 = vpack.c.bf16 %v300_v43, %v299_v42  ;;  %v306_v47 = vpack.c.bf16 %v302_v46, %v301_v45  ;;  %v339_v50 = vld [vmem:[#allocation7] sm:$0xf]  ;;  %v2474_v54 = vld [vmem:[#allocation8 + $0xf0] sm:$0xff]  ;;  %v2449_v45 = vld [vmem:[#allocation8 + $0x28] sm:$0xff] }
  0x58   : > { %573 = vmatpush.bf16.msra.mxu2 %v2145_v18  ;;  %602 = vmatpush.bf16.msra.mxu3 %v2149_v22  ;;  %v3003_v51 = vperm.slane %v339_v50, 0  ;;  %v3005_v52 = vperm.slane %v339_v50, 1  ;;  %v3015_v61 = vperm.slane %v339_v50, 2  ;;  %v3019_v63 = vperm.slane %v339_v50, 3  ;;  %v2457_v46 = vld [vmem:[#allocation8 + $0x68] sm:$0xff]  ;;  %p2765_p4 = pnand %p2764_p1, %p2947_p7  ;;  %p2770_p2 = por %p2769_p9, %p2768_p11 }
  0x5a   : > { %516 = vmatpush.bf16.msra.mxu0 %v2121_v28  ;;  %p2766_p8 = pneg %p2765_p4 }
  0x5b   : > { %545 = vmatpush.bf16.msra.mxu1 %v2125_v31 }
  0x5c   : > { %574 = vmatpush.bf16.msra.mxu2 %v2129_v32  ;;  %603 = vmatpush.bf16.msra.mxu3 %v2133_v33  ;;  %p2771_p10 = pnand %p2770_p2, %p2766_p8 }
  0x5d   : > { %517 = vmatmul.bf16.vlgmr.msra.gmra.mxu0 %v303_v34 }
  0x5e   : > { %546 = vmatmul.bf16.vlgmr.msra.gmra.mxu1 %v303_v34  ;;  %1861 = vmatpush.bf16.msrb.mxu0 %v2451_v39 }
  0x5f   : > { %575 = vmatmul.bf16.vlgmr.msra.gmra.mxu2 %v303_v34  ;;  %604 = vmatmul.bf16.vlgmr.msra.gmra.mxu3 %v303_v34 }
  0x60   : > { %1919 = vmatpush.bf16.msrb.mxu2 %v2467_v38  ;;  %1948 = vmatpush.bf16.msrb.mxu3 %v2475_v40 }
  0x61   : > { %1890 = vmatpush.bf16.msrb.mxu1 %v2459_v41 }
  0x62   : > { %1862 = vmatpush.bf16.msrb.mxu0 %v2450_v48 }
  0x64   : > { %1920 = vmatpush.bf16.msrb.mxu2 %v2466_v53  ;;  %1949 = vmatpush.bf16.msrb.mxu3 %v2474_v54 }
  0x65   : > { %1891 = vmatpush.bf16.msrb.mxu1 %v2458_v49 }
  0x66   : > { %1863 = vmatpush.bf16.msrb.mxu0 %v2449_v45 }
  0x69   : > { %1892 = vmatpush.bf16.msrb.mxu1 %v2457_v46 }
  0x6d   : > { %522 = vmatmul.bf16.gmra.mxu0 %v304_v37 }
  0x6e   : > { %551 = vmatmul.bf16.gmra.mxu1 %v304_v37 }
  0x6f   : > { %580 = vmatmul.bf16.gmra.mxu2 %v304_v37  ;;  %609 = vmatmul.bf16.gmra.mxu3 %v304_v37 }
  0x7d   : > { %527 = vmatmul.bf16.gmra.mxu0 %v305_v44 }
  0x7e   : > { %556 = vmatmul.bf16.gmra.mxu1 %v305_v44 }
  0x7f   : > { %585 = vmatmul.bf16.gmra.mxu2 %v305_v44  ;;  %614 = vmatmul.bf16.gmra.mxu3 %v305_v44 }
  0x8d   : > { %532 = vmatmul.bf16.gmra.mxu0 %v306_v47 }
  0x8e   : > { %561 = vmatmul.bf16.gmra.mxu1 %v306_v47 }
  0x8f   : > { %590 = vmatmul.bf16.gmra.mxu2 %v306_v47  ;;  %619 = vmatmul.bf16.gmra.mxu3 %v306_v47 }
  0xda   : > { %v518_v55 = vpop.f32.mrf.mxu0 }
  0xdb   : > { %v3008_v56 = vadd.f32 %v518_v55, %v3003_v51  ;;  %v547_v57 = vpop.f32.mrf.mxu1 }
  0xdc   : > { %v3011_v58 = vadd.f32 %v547_v57, %v3005_v52 }
  0xdd   : > { %v657_v59 = vmul.f32 0.70710677, %v3008_v56 }
  0xde   : > { %v658_v60 = vmul.f32 0.70710677, %v3011_v58 }
  0xdf   : > { %v3017_v62 = vclamps-f32 %v657_v59, 4.0 }
  0xe0   : > { %v3021_v0 = vclamps-f32 %v658_v60, 4.0 }
  0xe1   : > { %v3025_v1 = vmul.f32 %v3017_v62, %v3017_v62 }
  0xe2   : > { %v576_v2 = vpop.f32.mrf.mxu2  ;;  %v3029_v3 = vmul.f32 %v3021_v0, %v3021_v0  ;;  %v605_v5 = vpop.f32.mrf.mxu3 }
  0xe3   : > { %v3032_v4 = vadd.f32 %v576_v2, %v3015_v61  ;;  %v520_v6 = vpop.f32.mrf.mxu0  ;;  %v785_v7 = vmul.f32 -2.7261424e-10, %v3025_v1  ;;  %v1201_v8 = vmul.f32 -1.45660715e-05, %v3025_v1  ;;  %v3037_v9 = vadd.f32 %v605_v5, %v3019_v63 }
  0xe4   : > { %v786_v10 = vmul.f32 -2.7261424e-10, %v3029_v3  ;;  %v1202_v11 = vmul.f32 -1.45660715e-05, %v3029_v3  ;;  %v3042_v12 = vadd.f32 %v520_v6, %v3003_v51  ;;  %v2465_v6 = vld [vmem:[#allocation8 + $0xa8] sm:$0xff] }
  0xe5   : > { %v817_v13 = vadd.f32 2.7706815e-08, %v785_v7  ;;  %v1233_v14 = vadd.f32 -0.00021337405, %v1201_v8  ;;  %v659_v15 = vmul.f32 0.70710677, %v3032_v4  ;;  %1921 = vmatpush.bf16.msrb.mxu2 %v2465_v6 }
  0xe6   : > { %v818_v16 = vadd.f32 2.7706815e-08, %v786_v10  ;;  %v1234_v17 = vadd.f32 -0.00021337405, %v1202_v11  ;;  %v660_v21 = vmul.f32 0.70710677, %v3037_v9 }
  0xe7   : > { %v849_v18 = vmul.f32 %v817_v13, %v3025_v1  ;;  %v1265_v19 = vmul.f32 %v1233_v14, %v3025_v1  ;;  %v3047_v20 = vclamps-f32 %v659_v15, 4.0  ;;  %v661_v24 = vmul.f32 0.70710677, %v3042_v12  ;;  %v2473_v7 = vld [vmem:[#allocation8 + $0xe8] sm:$0xff] }
  0xe8   : > { %v850_v22 = vmul.f32 %v818_v16, %v3029_v3  ;;  %v1266_v23 = vmul.f32 %v1234_v17, %v3029_v3  ;;  %v3057_v28 = vclamps-f32 %v660_v21, 4.0  ;;  %1950 = vmatpush.bf16.msrb.mxu3 %v2473_v7 }
  0xe9   : > { %v881_v25 = vadd.f32 -2.101024e-06, %v849_v18  ;;  %v1297_v26 = vadd.f32 -0.001682827, %v1265_v19  ;;  %v3055_v27 = vmul.f32 %v3047_v20, %v3047_v20  ;;  %v3067_v36 = vclamps-f32 %v661_v24, 4.0 }
  0xea   : > { %v882_v29 = vadd.f32 -2.101024e-06, %v850_v22  ;;  %v1298_v30 = vadd.f32 -0.001682827, %v1266_v23  ;;  %v3065_v35 = vmul.f32 %v3057_v28, %v3057_v28  ;;  %v607_v7 = vpop.f32.mrf.mxu3 }
  0xeb   : > { %v913_v31 = vmul.f32 %v881_v25, %v3025_v1  ;;  %v787_v32 = vmul.f32 -2.7261424e-10, %v3055_v27  ;;  %v1329_v33 = vmul.f32 %v1297_v26, %v3025_v1  ;;  %v1203_v39 = vmul.f32 -1.45660715e-05, %v3055_v27  ;;  %v549_v25 = vpop.f32.mrf.mxu1 }
  0xec   : > { %v914_v34 = vmul.f32 %v882_v29, %v3029_v3  ;;  %v1330_v41 = vmul.f32 %v1298_v30, %v3029_v3  ;;  %v788_v44 = vmul.f32 -2.7261424e-10, %v3065_v35  ;;  %v1204_v49 = vmul.f32 -1.45660715e-05, %v3065_v35 }
  0xed   : > { %v945_v37 = vadd.f32 -5.6925062e-05, %v913_v31  ;;  %v819_v38 = vadd.f32 2.7706815e-08, %v787_v32  ;;  %v1361_v47 = vadd.f32 -0.0073733293, %v1329_v33  ;;  %v3078_v55 = vmul.f32 %v3067_v36, %v3067_v36 }
  0xee   : > { %v946_v40 = vadd.f32 -5.6925062e-05, %v914_v34  ;;  %v1235_v54 = vadd.f32 -0.00021337405, %v1203_v39  ;;  %v1362_v59 = vadd.f32 -0.0073733293, %v1330_v41 }
  0xef   : > { %v977_v42 = vmul.f32 %v945_v37, %v3025_v1  ;;  %v851_v43 = vmul.f32 %v819_v38, %v3055_v27  ;;  %v820_v5 = vadd.f32 2.7706815e-08, %v788_v44  ;;  %v1393_v8 = vmul.f32 %v1361_v47, %v3025_v1  ;;  %v578_v47 = vpop.f32.mrf.mxu2 }
  0xf0   : > { %v978_v48 = vmul.f32 %v946_v40, %v3029_v3  ;;  %v1236_v11 = vadd.f32 -0.00021337405, %v1204_v49  ;;  %v1267_v14 = vmul.f32 %v1235_v54, %v3055_v27  ;;  %v789_v16 = vmul.f32 -2.7261424e-10, %v3078_v55 }
  0xf1   : > { %v1009_v50 = vadd.f32 -0.00073499064, %v977_v42  ;;  %v883_v53 = vadd.f32 -2.101024e-06, %v851_v43  ;;  %v852_v15 = vmul.f32 %v820_v5, %v3065_v35  ;;  %v1394_v18 = vmul.f32 %v1362_v59, %v3029_v3 }
  0xf2   : > { %v1010_v57 = vadd.f32 -0.00073499064, %v978_v48  ;;  %v1268_v22 = vmul.f32 %v1236_v11, %v3065_v35  ;;  %v821_v23 = vadd.f32 2.7706815e-08, %v789_v16  ;;  %v1205_v24 = vmul.f32 -1.45660715e-05, %v3078_v55 }
  0xf3   : > { %v1041_v60 = vmul.f32 %v1009_v50, %v3025_v1  ;;  %v915_v2 = vmul.f32 %v883_v53, %v3055_v27  ;;  %v884_v21 = vadd.f32 -2.101024e-06, %v852_v15  ;;  %v1425_v26 = vadd.f32 -0.014264739, %v1393_v8  ;;  %v2448_v8 = vld [vmem:[#allocation8 + $0x20] sm:$0xff] }
  0xf4   : > { %v1042_v10 = vmul.f32 %v1010_v57, %v3029_v3  ;;  %v1299_v30 = vadd.f32 -0.001682827, %v1267_v14  ;;  %v853_v32 = vmul.f32 %v821_v23, %v3078_v55  ;;  %v1426_v34 = vadd.f32 -0.014264739, %v1394_v18  ;;  %1864 = vmatpush.bf16.msrb.mxu0 %v2448_v8 }
  0xf5   : > { %v1073_v13 = vadd.f32 -0.0029546001, %v1041_v60  ;;  %v947_v19 = vadd.f32 -5.6925062e-05, %v915_v2  ;;  %v916_v31 = vmul.f32 %v884_v21, %v3065_v35  ;;  %v550_v37 = vadd.f32 %v549_v25, %v3005_v52 }
  0xf6   : > { %v1074_v17 = vadd.f32 -0.0029546001, %v1042_v10  ;;  %v1300_v39 = vadd.f32 -0.001682827, %v1268_v22  ;;  %v885_v40 = vadd.f32 -2.101024e-06, %v853_v32  ;;  %2563 = vrcp.f32 %v1425_v26 }
  0xf7   : > { %v1105_v29 = vmul.f32 %v1073_v13, %v3025_v1  ;;  %v979_v38 = vmul.f32 %v947_v19, %v3055_v27  ;;  %v1237_v41 = vadd.f32 -0.00021337405, %v1205_v24  ;;  %v948_v42 = vadd.f32 -5.6925062e-05, %v916_v31  ;;  %v2456_v10 = vld [vmem:[#allocation8 + $0x60] sm:$0xff] }
  0xf8   : > { %v1106_v33 = vmul.f32 %v1074_v17, %v3029_v3  ;;  %v1331_v1 = vmul.f32 %v1299_v30, %v3055_v27  ;;  %v917_v44 = vmul.f32 %v885_v40, %v3078_v55  ;;  %2565 = vrcp.f32 %v1426_v34  ;;  %1893 = vmatpush.bf16.msrb.mxu1 %v2456_v10 }
  0xf9   : > { %v1137_v43 = vadd.f32 -0.016096033, %v1105_v29  ;;  %v662_v46 = vmul.f32 0.70710677, %v550_v37  ;;  %v1011_v3 = vadd.f32 -0.00073499064, %v979_v38  ;;  %v1332_v48 = vmul.f32 %v1300_v39, %v3065_v35 }
  0xfa   : > { %v1138_v45 = vadd.f32 -0.016096033, %v1106_v33  ;;  %v949_v49 = vadd.f32 -5.6925062e-05, %v917_v44  ;;  %v1269_v50 = vmul.f32 %v1237_v41, %v3078_v55  ;;  %v3101_v53 = vmul.f32 0.5, %v3008_v56 }
  0xfb   : > { %v3104_v54 = vmul.f32 0.5, %v3011_v58  ;;  %v980_v57 = vmul.f32 %v948_v42, %v3065_v35  ;;  %v3107_v59 = vclamps-f32 %v662_v46, 4.0  ;;  %v1169_v60 = vmul.f32 %v3017_v62, %v1137_v43  ;;  %v2472_v42 = vld [vmem:[#allocation8 + $0xe0] sm:$0xff] }
  0xfc   : > { %v1363_v2 = vadd.f32 -0.0073733293, %v1331_v1  ;;  %v981_v5 = vmul.f32 %v949_v49, %v3078_v55  ;;  %v3112_v6 = vadd.f32 %v578_v47, %v3015_v61  ;;  %v1170_v56 = vmul.f32 %v3021_v0, %v1138_v45  ;;  %v2564_v13 = vpop.eup %2563  ;;  %v552_v49 = vpop.f32.mrf.mxu1  ;;  %1951 = vmatpush.bf16.msrb.mxu3 %v2472_v42 }
  0xfd   : > { %v3116_v58 = vmul.f32 0.5, %v3032_v4  ;;  %v3119_v11 = vmul.f32 0.5, %v3037_v9  ;;  %v3123_v62 = vmul.f32 %v3107_v59, %v3107_v59  ;;  %v1043_v14 = vmul.f32 %v1011_v3, %v3055_v27 }
  0xfe   : > { %v1364_v15 = vadd.f32 -0.0073733293, %v1332_v48  ;;  %v3127_v16 = vmul.f32 0.5, %v3042_v12  ;;  %v1301_v17 = vadd.f32 -0.001682827, %v1269_v50  ;;  %v2566_v0 = vpop.eup %2565  ;;  %v3132_v19 = vadd.f32 %v607_v7, %v3019_v63  ;;  %v523_v12 = vpop.f32.mrf.mxu0 }
  0xff   : > { %v1012_v4 = vadd.f32 -0.00073499064, %v980_v57  ;;  %v790_v18 = vmul.f32 -2.7261424e-10, %v3123_v62  ;;  %v1206_v9 = vmul.f32 -1.45660715e-05, %v3123_v62  ;;  %v1489_v21 = vmul.f32 %v2564_v13, %v1169_v60 }
 0x100   : > { %v1395_v22 = vmul.f32 %v1363_v2, %v3055_v27  ;;  %v1013_v23 = vadd.f32 -0.00073499064, %v981_v5  ;;  %v663_v24 = vmul.f32 0.70710677, %v3112_v6  ;;  %v1490_v25 = vmul.f32 %v2566_v0, %v1170_v56 }
 0x101   : > { %v3136_v26 = vmul.f32 0.5, %v550_v37  ;;  %v822_v29 = vadd.f32 2.7706815e-08, %v790_v18  ;;  %v1238_v30 = vadd.f32 -0.00021337405, %v1206_v9  ;;  %v1396_v32 = vmul.f32 %v1364_v15, %v3065_v35  ;;  %v2464_v37 = vld [vmem:[#allocation8 + $0xa0] sm:$0xff] }
 0x102   : > { %v1075_v31 = vadd.f32 -0.0029546001, %v1043_v14  ;;  %v1333_v33 = vmul.f32 %v1301_v17, %v3078_v55  ;;  %v3140_v34 = vclamps-f32 %v663_v24, 4.0  ;;  %v1044_v38 = vmul.f32 %v1012_v4, %v3065_v35  ;;  %1922 = vmatpush.bf16.msrb.mxu2 %v2464_v37 }
 0x103   : > { %v854_v39 = vmul.f32 %v822_v29, %v3123_v62  ;;  %v664_v40 = vmul.f32 0.70710677, %v3132_v19  ;;  %v3146_v41 = vadd.f32 %v523_v12, %v3003_v51  ;;  %v1521_v43 = vadd.f32 1.0, %v1489_v21 }
 0x104   : > { %v1427_v1 = vadd.f32 -0.014264739, %v1395_v22  ;;  %v1045_v44 = vmul.f32 %v1013_v23, %v3078_v55  ;;  %v3151_v45 = vmul.f32 %v3140_v34, %v3140_v34  ;;  %v1522_v46 = vadd.f32 1.0, %v1490_v25  ;;  %v2447_v22 = vld [vmem:[#allocation8 + $0x18] sm:$0xff] }
 0x105   : > { %v886_v47 = vadd.f32 -2.101024e-06, %v854_v39  ;;  %v1270_v3 = vmul.f32 %v1238_v30, %v3123_v62  ;;  %v3154_v48 = vclamps-f32 %v664_v40, 4.0  ;;  %v1107_v50 = vmul.f32 %v1075_v31, %v3055_v27  ;;  %v2455_v23 = vld [vmem:[#allocation8 + $0x58] sm:$0xff]  ;;  %1865 = vmatpush.bf16.msrb.mxu0 %v2447_v22  ;;  %v581_v40 = vpop.f32.mrf.mxu2 }
 0x106   : > { %v1428_v57 = vadd.f32 -0.014264739, %v1396_v32  ;;  %v1365_v60 = vadd.f32 -0.0073733293, %v1333_v33  ;;  %v791_v2 = vmul.f32 -2.7261424e-10, %v3151_v45  ;;  %v3166_v15 = vadd.f32 %v552_v49, %v3005_v52  ;;  %1894 = vmatpush.bf16.msrb.mxu1 %v2455_v23 }
 0x107   : > { %v1076_v5 = vadd.f32 -0.0029546001, %v1044_v38  ;;  %v918_v7 = vmul.f32 %v886_v47, %v3123_v62  ;;  %v1207_v8 = vmul.f32 -1.45660715e-05, %v3151_v45  ;;  %v3162_v10 = vmul.f32 %v3154_v48, %v3154_v48 }
 0x108   : > { %v1077_v56 = vadd.f32 -0.0029546001, %v1045_v44  ;;  %v823_v13 = vadd.f32 2.7706815e-08, %v791_v2  ;;  %v665_v14 = vmul.f32 0.70710677, %v3146_v41  ;;  %2567 = vrcp.f32 %v1427_v1 }
 0x109   : > { %v950_v27 = vadd.f32 -5.6925062e-05, %v918_v7  ;;  %v1302_v17 = vadd.f32 -0.001682827, %v1270_v3  ;;  %v792_v0 = vmul.f32 -2.7261424e-10, %v3162_v10  ;;  %v3170_v4 = vmul.f32 %v1521_v43, %v3101_v53 }
 0x10a   : > { %v1139_v18 = vadd.f32 -0.016096033, %v1107_v50  ;;  %v1397_v9 = vmul.f32 %v1365_v60, %v3078_v55  ;;  %v855_v21 = vmul.f32 %v823_v13, %v3151_v45  ;;  %v1108_v24 = vmul.f32 %v1076_v5, %v3065_v35  ;;  %v2471_v13 = vld [vmem:[#allocation8 + $0xd8] sm:$0xff] }
 0x10b   : > { %v982_v12 = vmul.f32 %v950_v27, %v3123_v62  ;;  %v1239_v25 = vadd.f32 -0.00021337405, %v1207_v8  ;;  %v824_v29 = vadd.f32 2.7706815e-08, %v792_v0  ;;  %v1109_v30 = vmul.f32 %v1077_v56, %v3078_v55  ;;  %v2463_v56 = vld [vmem:[#allocation8 + $0x98] sm:$0xff]  ;;  %1952 = vmatpush.bf16.msrb.mxu3 %v2471_v13 }
 0x10c   : > { %v887_v31 = vadd.f32 -2.101024e-06, %v855_v21  ;;  %v1208_v32 = vmul.f32 -1.45660715e-05, %v3162_v10  ;;  %v3178_v53 = vclamps-f32 %v665_v14, 4.0  ;;  %v3181_v33 = vmul.f32 %v1522_v46, %v3104_v54  ;;  %1923 = vmatpush.bf16.msrb.mxu2 %v2463_v56 }
 0x10d   : > { %v1014_v38 = vadd.f32 -0.00073499064, %v982_v12  ;;  %v1334_v39 = vmul.f32 %v1302_v17, %v3123_v62  ;;  %v856_v35 = vmul.f32 %v824_v29, %v3162_v10  ;;  %v1171_v37 = vmul.f32 %v3047_v20, %v1139_v18  ;;  %v610_v18 = vpop.f32.mrf.mxu3 }
 0x10e   : > { %v1429_v42 = vadd.f32 -0.014264739, %v1397_v9  ;;  %v919_v55 = vmul.f32 %v887_v31, %v3151_v45  ;;  %v3189_v43 = vmul.f32 %v3178_v53, %v3178_v53  ;;  %v2568_v1 = vpop.eup %2567  ;;  %v1140_v44 = vadd.f32 -0.016096033, %v1108_v24 }
 0x10f   : > { %2569 = vrcp.f32 %v1428_v57  ;;  %v1271_v54 = vmul.f32 %v1239_v25, %v3151_v45  ;;  %v888_v46 = vadd.f32 -2.101024e-06, %v856_v35  ;;  %v1141_v47 = vadd.f32 -0.016096033, %v1109_v30  ;;  %v2446_v35 = vld [vmem:[#allocation8 + $0x10] sm:$0xff] }
 0x110   : > { %v1240_v3 = vadd.f32 -0.00021337405, %v1208_v32  ;;  %v793_v49 = vmul.f32 -2.7261424e-10, %v3189_v43  ;;  %v3194_v50 = vadd.f32 %v581_v40, %v3015_v61  ;;  %v1046_v20 = vmul.f32 %v1014_v38, %v3123_v62  ;;  %v2454_v40 = vld [vmem:[#allocation8 + $0x50] sm:$0xff]  ;;  %1866 = vmatpush.bf16.msrb.mxu0 %v2446_v35 }
 0x111   : > { %v1366_v60 = vadd.f32 -0.0073733293, %v1334_v39  ;;  %v920_v2 = vmul.f32 %v888_v46, %v3162_v10  ;;  %v666_v5 = vmul.f32 0.70710677, %v3166_v15  ;;  %v1491_v7 = vmul.f32 %v2568_v1, %v1171_v37  ;;  %1895 = vmatpush.bf16.msrb.mxu1 %v2454_v40 }
 0x112   : > { %2571 = vrcp.f32 %v1429_v42  ;;  %v3200_v57 = vmul.f32 0.5, %v3112_v6  ;;  %v951_v8 = vadd.f32 -5.6925062e-05, %v919_v55  ;;  %v1303_v14 = vadd.f32 -0.001682827, %v1271_v54  ;;  %v525_v54 = vpop.f32.mrf.mxu0 }
 0x113   : > { %v3203_v27 = vmul.f32 0.5, %v3132_v19  ;;  %v825_v17 = vadd.f32 2.7706815e-08, %v793_v49  ;;  %v3205_v0 = vclamps-f32 %v666_v5, 4.0  ;;  %v1172_v9 = vmul.f32 %v3057_v28, %v1140_v44 }
 0x114   : > { %v952_v21 = vadd.f32 -5.6925062e-05, %v920_v2  ;;  %v1272_v22 = vmul.f32 %v1240_v3, %v3162_v10  ;;  %v667_v23 = vmul.f32 0.70710677, %v3194_v50  ;;  %v1173_v24 = vmul.f32 %v3067_v36, %v1141_v47 }
 0x115   : > { %v2570_v6 = vpop.eup %2569  ;;  %v1078_v12 = vadd.f32 -0.0029546001, %v1046_v20  ;;  %v1398_v19 = vmul.f32 %v1366_v60, %v3123_v62  ;;  %v3214_v25 = vmul.f32 %v3205_v0, %v3205_v0  ;;  %v1523_v29 = vadd.f32 1.0, %v1491_v7 }
 0x116   : > { %v983_v28 = vmul.f32 %v951_v8, %v3151_v45  ;;  %v3217_v30 = vclamps-f32 %v667_v23, 4.0  ;;  %v3220_v31 = vadd.f32 %v610_v18, %v3019_v63  ;;  %v1335_v32 = vmul.f32 %v1303_v14, %v3151_v45  ;;  %v2470_v23 = vld [vmem:[#allocation8 + $0xd0] sm:$0xff] }
 0x117   : > { %v3224_v38 = vmul.f32 0.5, %v3146_v41  ;;  %v857_v36 = vmul.f32 %v825_v17, %v3189_v43  ;;  %v794_v39 = vmul.f32 -2.7261424e-10, %v3214_v25  ;;  %v1492_v42 = vmul.f32 %v2570_v6, %v1172_v9  ;;  %1953 = vmatpush.bf16.msrb.mxu3 %v2470_v23 }
 0x118   : > { %v2572_v37 = vpop.eup %2571  ;;  %v984_v55 = vmul.f32 %v952_v21, %v3162_v10  ;;  %v1304_v1 = vadd.f32 -0.001682827, %v1272_v22  ;;  %v3231_v44 = vmul.f32 %v3217_v30, %v3217_v30  ;;  %v1110_v41 = vmul.f32 %v1078_v12, %v3123_v62  ;;  %v2462_v22 = vld [vmem:[#allocation8 + $0x90] sm:$0xff] }
 0x119   : > { %3976 = vst [vmem:[#allocation15_spill] sm:$0xff] %v3224_v38  ;;  %v1493_v46 = vmul.f32 %v2572_v37, %v1173_v24  ;;  %v1430_v47 = vadd.f32 -0.014264739, %v1398_v19  ;;  %v826_v3 = vadd.f32 2.7706815e-08, %v794_v39  ;;  %v3235_v49 = vmul.f32 %v1523_v29, %v3116_v58  ;;  %v554_v58 = vpop.f32.mrf.mxu1  ;;  %1924 = vmatpush.bf16.msrb.mxu2 %v2462_v22 }
 0x11a   : > { %3977 = vst [vmem:[#allocation16_spill] sm:$0xff] %v3231_v44  ;;  %v1015_v20 = vadd.f32 -0.00073499064, %v983_v28  ;;  %v795_v60 = vmul.f32 -2.7261424e-10, %v3231_v44  ;;  %v3241_v56 = vadd.f32 %v525_v54, %v3003_v51  ;;  %v1336_v13 = vmul.f32 %v1304_v1, %v3162_v10 }
 0x11b   : > { %v668_v2 = vmul.f32 0.70710677, %v3220_v31  ;;  %v1367_v5 = vadd.f32 -0.0073733293, %v1335_v32  ;;  %v889_v7 = vadd.f32 -2.101024e-06, %v857_v36  ;;  %v858_v8 = vmul.f32 %v826_v3, %v3214_v25 }
 0x11c   : > { %v1016_v62 = vadd.f32 -0.00073499064, %v984_v55  ;;  %v827_v14 = vadd.f32 2.7706815e-08, %v795_v60  ;;  %v1524_v18 = vadd.f32 1.0, %v1492_v42  ;;  %v1525_v9 = vadd.f32 1.0, %v1493_v46 }
 0x11d   : > { %v3244_v17 = vclamps-f32 %v668_v2, 4.0  ;;  %v1142_v21 = vadd.f32 -0.016096033, %v1110_v41  ;;  %2573 = vrcp.f32 %v1430_v47  ;;  %v1047_v6 = vmul.f32 %v1015_v20, %v3151_v45 }
 0x11e   : > { %v890_v24 = vadd.f32 -2.101024e-06, %v858_v8  ;;  %v859_v12 = vmul.f32 %v827_v14, %v3231_v44  ;;  %v1399_v29 = vmul.f32 %v1367_v5, %v3151_v45  ;;  %v921_v28 = vmul.f32 %v889_v7, %v3189_v43 }
 0x11f   : > { %v3250_v19 = vmul.f32 %v3244_v17, %v3244_v17  ;;  %v669_v32 = vmul.f32 0.70710677, %v3241_v56  ;;  %v3256_v36 = vadd.f32 %v554_v58, %v3005_v52  ;;  %v1048_v39 = vmul.f32 %v1016_v62, %v3162_v10 }
 0x120   : > { %v1368_v35 = vadd.f32 -0.0073733293, %v1336_v13  ;;  %v891_v40 = vadd.f32 -2.101024e-06, %v859_v12  ;;  %v3261_v42 = vmul.f32 %v1524_v18, %v3119_v11  ;;  %v1174_v55 = vmul.f32 %v3107_v59, %v1142_v21 }
 0x121   : > { %3978 = vst [vmem:[#allocation17_spill] sm:$0xff] %v3250_v19  ;;  %v796_v37 = vmul.f32 -2.7261424e-10, %v3250_v19  ;;  %v3265_v1 = vmul.f32 0.5, %v3166_v15  ;;  %v3267_v54 = vclamps-f32 %v669_v32, 4.0  ;;  %v3270_v46 = vmul.f32 %v1525_v9, %v3127_v16  ;;  %v583_v15 = vpop.f32.mrf.mxu2  ;;  %v2445_v32 = vld [vmem:[#allocation8 + $0x8] sm:$0xff] }
 0x122   : > { %v1079_v41 = vadd.f32 -0.0029546001, %v1047_v6  ;;  %v922_v47 = vmul.f32 %v890_v24, %v3214_v25  ;;  %v953_v60 = vadd.f32 -5.6925062e-05, %v921_v28  ;;  %v923_v2 = vmul.f32 %v891_v40, %v3231_v44  ;;  %1867 = vmatpush.bf16.msrb.mxu0 %v2445_v32 }
 0x123   : > { %3979 = vst [vmem:[#allocation18_spill] sm:$0xff] %v3265_v1  ;;  %v828_v3 = vadd.f32 2.7706815e-08, %v796_v37  ;;  %v2574_v20 = vpop.eup %2573  ;;  %v3276_v11 = vmul.f32 %v3267_v54, %v3267_v54  ;;  %v670_v59 = vmul.f32 0.70710677, %v3256_v36  ;;  %v1400_v16 = vmul.f32 %v1368_v35, %v3162_v10 }
 0x124   : > { %v1431_v5 = vadd.f32 -0.014264739, %v1399_v29  ;;  %v1080_v7 = vadd.f32 -0.0029546001, %v1048_v39  ;;  %v1494_v62 = vmul.f32 %v2574_v20, %v1174_v55  ;;  %v3282_v13 = vmul.f32 0.5, %v3194_v50  ;;  %v612_v50 = vpop.f32.mrf.mxu3  ;;  %v2453_v39 = vld [vmem:[#allocation8 + $0x48] sm:$0xff] }
 0x125   : > { %v860_v8 = vmul.f32 %v828_v3, %v3250_v19  ;;  %v797_v14 = vmul.f32 -2.7261424e-10, %v3276_v11  ;;  %v3285_v58 = vclamps-f32 %v670_v59, 4.0  ;;  %v1111_v18 = vmul.f32 %v1079_v41, %v3151_v45  ;;  %v528_v41 = vpop.f32.mrf.mxu0  ;;  %1896 = vmatpush.bf16.msrb.mxu1 %v2453_v39 }
 0x126   : > { %3980 = vst [vmem:[#allocation19_spill] sm:$0xff] %v3282_v13  ;;  %v954_v9 = vadd.f32 -5.6925062e-05, %v922_v47  ;;  %v3289_v22 = vadd.f32 %v583_v15, %v3015_v61  ;;  %v985_v23 = vmul.f32 %v953_v60, %v3189_v43  ;;  %v955_v6 = vadd.f32 -5.6925062e-05, %v923_v2 }
 0x127   : > { %v892_v21 = vadd.f32 -2.101024e-06, %v860_v8  ;;  %v829_v24 = vadd.f32 2.7706815e-08, %v797_v14  ;;  %v3294_v12 = vmul.f32 %v3285_v58, %v3285_v58  ;;  %2575 = vrcp.f32 %v1431_v5 }
 0x128   : > { %v1112_v29 = vmul.f32 %v1080_v7, %v3162_v10  ;;  %v1432_v28 = vadd.f32 -0.014264739, %v1400_v16  ;;  %v3298_v45 = vmul.f32 0.5, %v3220_v31  ;;  %v671_v55 = vmul.f32 0.70710677, %v3289_v22 }
 0x129   : > { %v924_v35 = vmul.f32 %v892_v21, %v3250_v19  ;;  %v861_v40 = vmul.f32 %v829_v24, %v3276_v11  ;;  %v798_v37 = vmul.f32 -2.7261424e-10, %v3294_v12  ;;  %v1526_v47 = vadd.f32 1.0, %v1494_v62  ;;  %v557_v24 = vpop.f32.mrf.mxu1 }
 0x12a   : > { %3981 = vst [vmem:[#allocation20_spill] sm:$0xff] %v3298_v45  ;;  %v1143_v3 = vadd.f32 -0.016096033, %v1111_v18  ;;  %v986_v20 = vmul.f32 %v954_v9, %v3214_v25  ;;  %v3306_v10 = vadd.f32 %v612_v50, %v3019_v63  ;;  %v1017_v31 = vadd.f32 -0.00073499064, %v985_v23  ;;  %v2461_v50 = vld [vmem:[#allocation8 + $0x88] sm:$0xff] }
 0x12b   : > { %v987_v60 = vmul.f32 %v955_v6, %v3231_v44  ;;  %v830_v2 = vadd.f32 2.7706815e-08, %v798_v37  ;;  %v3309_v59 = vclamps-f32 %v671_v55, 4.0  ;;  %2577 = vrcp.f32 %v1432_v28  ;;  %v2469_v28 = vld [vmem:[#allocation8 + $0xc8] sm:$0xff]  ;;  %1925 = vmatpush.bf16.msrb.mxu2 %v2461_v50 }
 0x12c   : > { %v893_v15 = vadd.f32 -2.101024e-06, %v861_v40  ;;  %v672_v5 = vmul.f32 0.70710677, %v3306_v10  ;;  %v3313_v7 = vadd.f32 %v528_v41, %v3003_v51  ;;  %v1144_v16 = vadd.f32 -0.016096033, %v1112_v29  ;;  %1954 = vmatpush.bf16.msrb.mxu3 %v2469_v28 }
 0x12d   : > { %v956_v8 = vadd.f32 -5.6925062e-05, %v924_v35  ;;  %v862_v62 = vmul.f32 %v830_v2, %v3294_v12  ;;  %v3318_v14 = vmul.f32 %v3309_v59, %v3309_v59  ;;  %v2576_v18 = vpop.eup %2575  ;;  %v3321_v9 = vmul.f32 %v1526_v47, %v3136_v26 }
 0x12e   : > { %v1175_v21 = vmul.f32 %v3140_v34, %v1143_v3  ;;  %v1018_v23 = vadd.f32 -0.00073499064, %v986_v20  ;;  %v3324_v6 = vclamps-f32 %v672_v5, 4.0  ;;  %v1049_v29 = vmul.f32 %v1017_v31, %v3189_v43  ;;  %v2444_v5 = vld [vmem:[#allocation8] sm:$0xff] }
 0x12f   : > { %3982 = vst [vmem:[#allocation21_spill] sm:$0xff] %v3318_v14  ;;  %v1019_v32 = vadd.f32 -0.00073499064, %v987_v60  ;;  %v894_v39 = vadd.f32 -2.101024e-06, %v862_v62  ;;  %v3329_v40 = vmul.f32 0.5, %v3241_v56  ;;  %v925_v26 = vmul.f32 %v893_v15, %v3276_v11  ;;  %v586_v15 = vpop.f32.mrf.mxu2  ;;  %1868 = vmatpush.bf16.msrb.mxu0 %v2444_v5  ;;  %v615_v5 = vpop.f32.mrf.mxu3 }
 0x130   : > { %v799_v35 = vmul.f32 -2.7261424e-10, %v3318_v14  ;;  %v3334_v34 = vmul.f32 %v3324_v6, %v3324_v6  ;;  %v673_v37 = vmul.f32 0.70710677, %v3313_v7  ;;  %v1176_v55 = vmul.f32 %v3154_v48, %v1144_v16 }
 0x131   : > { %3983 = vst [vmem:[#allocation22_spill] sm:$0xff] %v3329_v40  ;;  %v988_v41 = vmul.f32 %v956_v8, %v3250_v19  ;;  %v3340_v3 = vadd.f32 %v557_v24, %v3005_v52  ;;  %v2578_v56 = vpop.eup %2577  ;;  %v1495_v20 = vmul.f32 %v2576_v18, %v1175_v21  ;;  %v926_v31 = vmul.f32 %v894_v39, %v3294_v12  ;;  %v2452_v8 = vld [vmem:[#allocation8 + $0x40] sm:$0xff] }
 0x132   : > { %v831_v47 = vadd.f32 2.7706815e-08, %v799_v35  ;;  %v800_v60 = vmul.f32 -2.7261424e-10, %v3334_v34  ;;  %v3344_v2 = vclamps-f32 %v673_v37, 4.0  ;;  %v1050_v50 = vmul.f32 %v1018_v23, %v3214_v25  ;;  %1897 = vmatpush.bf16.msrb.mxu1 %v2452_v8 }
 0x133   : > { %v1081_v62 = vadd.f32 -0.0029546001, %v1049_v29  ;;  %v1051_v48 = vmul.f32 %v1019_v32, %v3231_v44  ;;  %v957_v24 = vadd.f32 -5.6925062e-05, %v925_v26  ;;  %v674_v21 = vmul.f32 0.70710677, %v3340_v3 }
 0x134   : > { %v863_v16 = vmul.f32 %v831_v47, %v3318_v14  ;;  %v832_v28 = vadd.f32 2.7706815e-08, %v800_v60  ;;  %v3351_v18 = vmul.f32 %v3344_v2, %v3344_v2  ;;  %v1496_v39 = vmul.f32 %v2578_v56, %v1176_v55 }
 0x135   : > { %v1020_v35 = vadd.f32 -0.00073499064, %v988_v41  ;;  %v3355_v29 = vadd.f32 %v586_v15, %v3015_v61  ;;  %v958_v23 = vadd.f32 -5.6925062e-05, %v926_v31  ;;  %v3359_v47 = vclamps-f32 %v674_v21, 4.0 }
 0x136   : > { %v895_v37 = vadd.f32 -2.101024e-06, %v863_v16  ;;  %v864_v32 = vmul.f32 %v832_v28, %v3334_v34  ;;  %v801_v26 = vmul.f32 -2.7261424e-10, %v3351_v18  ;;  %v1113_v60 = vmul.f32 %v1081_v62, %v3189_v43  ;;  %v2460_v16 = vld [vmem:[#allocation8 + $0x80] sm:$0xff] }
 0x137   : > { %v1082_v45 = vadd.f32 -0.0029546001, %v1050_v50  ;;  %v3363_v13 = vmul.f32 0.5, %v3256_v36  ;;  %v1083_v41 = vadd.f32 -0.0029546001, %v1051_v48  ;;  %v989_v56 = vmul.f32 %v957_v24, %v3276_v11  ;;  %1926 = vmatpush.bf16.msrb.mxu2 %v2460_v16 }
 0x138   : > { %v927_v55 = vmul.f32 %v895_v37, %v3318_v14  ;;  %v833_v15 = vadd.f32 2.7706815e-08, %v801_v26  ;;  %v3369_v31 = vmul.f32 %v3359_v47, %v3359_v47  ;;  %v1527_v8 = vadd.f32 1.0, %v1495_v20 }
 0x139   : > { %3984 = vst [vmem:[#allocation23_spill] sm:$0xff] %v3363_v13  ;;  %v1528_v28 = vadd.f32 1.0, %v1496_v39  ;;  %v1052_v62 = vmul.f32 %v1020_v35, %v3250_v19  ;;  %v675_v50 = vmul.f32 0.70710677, %v3355_v29  ;;  %v990_v36 = vmul.f32 %v958_v23, %v3294_v12  ;;  %v530_v23 = vpop.f32.mrf.mxu0 }
 0x13a   : > { %v959_v21 = vadd.f32 -5.6925062e-05, %v927_v55  ;;  %v896_v37 = vadd.f32 -2.101024e-06, %v864_v32  ;;  %v802_v48 = vmul.f32 -2.7261424e-10, %v3369_v31  ;;  %v865_v26 = vmul.f32 %v833_v15, %v3351_v18 }
 0x13b   : > { %v1145_v24 = vadd.f32 -0.016096033, %v1113_v60  ;;  %v3376_v13 = vclamps-f32 %v675_v50, 4.0  ;;  %v3379_v1 = vadd.f32 %v615_v5, %v3019_v63  ;;  %v1114_v20 = vmul.f32 %v1082_v45, %v3214_v25 }
 0x13c   : > { %v1115_v39 = vmul.f32 %v1083_v41, %v3231_v44  ;;  %v1021_v35 = vadd.f32 -0.00073499064, %v989_v56  ;;  %v834_v40 = vadd.f32 2.7706815e-08, %v802_v48  ;;  %v3384_v32 = vmul.f32 %v1527_v8, %v3200_v57  ;;  %v2468_v56 = vld [vmem:[#allocation8 + $0xc0] sm:$0xff] }
 0x13d   : > { %v3387_v55 = vmul.f32 %v1528_v28, %v3203_v27  ;;  %v1084_v60 = vadd.f32 -0.0029546001, %v1052_v62  ;;  %v3391_v15 = vmul.f32 %v3376_v13, %v3376_v13  ;;  %v1022_v5 = vadd.f32 -0.00073499064, %v990_v36  ;;  %1955 = vmatpush.bf16.msrb.mxu3 %v2468_v56 }
 0x13e   : > { %v991_v16 = vmul.f32 %v959_v21, %v3318_v14  ;;  %v928_v45 = vmul.f32 %v896_v37, %v3334_v34  ;;  %v866_v41 = vmul.f32 %v834_v40, %v3369_v31  ;;  %v897_v50 = vadd.f32 -2.101024e-06, %v865_v26 }
 0x13f   : > { %v803_v57 = vmul.f32 -2.7261424e-10, %v3391_v15  ;;  %v676_v8 = vmul.f32 0.70710677, %v3379_v1  ;;  %v3399_v27 = vadd.f32 %v530_v23, %v3003_v51  ;;  %v3402_v28 = vmul.f32 %v3178_v53, %v1145_v24  ;;  %v559_v24 = vpop.f32.mrf.mxu1 }
 0x140   : > { %v1146_v62 = vadd.f32 -0.016096033, %v1114_v20  ;;  %v1147_v36 = vadd.f32 -0.016096033, %v1115_v39  ;;  %v1053_v21 = vmul.f32 %v1021_v35, %v3276_v11  ;;  %v1116_v37 = vmul.f32 %v1084_v60, %v3250_v19 }
 0x141   : > { %3985 = vst [vmem:[#allocation24_spill] sm:$0xff] %v3402_v28  ;;  %v3407_v40 = vmul.f32 0.5, %v3289_v22  ;;  %v898_v48 = vadd.f32 -2.101024e-06, %v866_v41  ;;  %v3409_v26 = vclamps-f32 %v676_v8, 4.0  ;;  %v1054_v38 = vmul.f32 %v1022_v5, %v3294_v12 }
 0x142   : > { %v1023_v23 = vadd.f32 -0.00073499064, %v991_v16  ;;  %v3413_v44 = vmul.f32 0.5, %v3306_v10  ;;  %v960_v53 = vadd.f32 -5.6925062e-05, %v928_v45  ;;  %v929_v20 = vmul.f32 %v897_v50, %v3351_v18  ;;  %v588_v45 = vpop.f32.mrf.mxu2 }
 0x143   : > { %3986 = vst [vmem:[#allocation25_spill] sm:$0xff] %v3407_v40  ;;  %v835_v39 = vadd.f32 2.7706815e-08, %v803_v57  ;;  %v3418_v35 = vmul.f32 %v3409_v26, %v3409_v26  ;;  %v677_v22 = vmul.f32 0.70710677, %v3399_v27  ;;  %v3422_v60 = vmul.f32 %v3205_v0, %v1146_v62 }
 0x144   : > { %3987 = vst [vmem:[#allocation26_spill] sm:$0xff] %v3413_v44  ;;  %v3425_v5 = vmul.f32 %v3217_v30, %v1147_v36  ;;  %v1085_v16 = vadd.f32 -0.0029546001, %v1053_v21  ;;  %v3428_v10 = vmul.f32 0.5, %v3313_v7  ;;  %v1148_v41 = vadd.f32 -0.016096033, %v1116_v37 }
 0x145   : > { %3988 = vst [vmem:[#allocation27_spill] sm:$0xff] %v3422_v60  ;;  %v930_v56 = vmul.f32 %v898_v48, %v3369_v31  ;;  %v804_v50 = vmul.f32 -2.7261424e-10, %v3418_v35  ;;  %v3433_v57 = vadd.f32 %v559_v24, %v3005_v52  ;;  %v1086_v8 = vadd.f32 -0.0029546001, %v1054_v38 }
 0x146   : > { %3989 = vst [vmem:[#allocation28_spill] sm:$0xff] %v3425_v5  ;;  %v1055_v0 = vmul.f32 %v1023_v23, %v3318_v14  ;;  %v992_v62 = vmul.f32 %v960_v53, %v3334_v34  ;;  %v3437_v30 = vclamps-f32 %v677_v22, 4.0  ;;  %v961_v36 = vadd.f32 -5.6925062e-05, %v929_v20  ;;  %v617_v22 = vpop.f32.mrf.mxu3 }
 0x147   : > { %3990 = vst [vmem:[#allocation29_spill] sm:$0xff] %v3428_v10  ;;  %v867_v7 = vmul.f32 %v835_v39, %v3391_v15  ;;  %v836_v21 = vadd.f32 2.7706815e-08, %v804_v50  ;;  %v3441_v37 = vadd.f32 %v588_v45, %v3015_v61  ;;  %v1117_v48 = vmul.f32 %v1085_v16, %v3276_v11 }
 0x148   : > { %v3445_v10 = vmul.f32 0.5, %v3340_v3  ;;  %v3448_v38 = vmul.f32 0.5, %v3355_v29  ;;  %v3452_v23 = vmul.f32 %v3437_v30, %v3437_v30  ;;  %v3455_v53 = vmul.f32 %v3244_v17, %v1148_v41 }
 0x149   : > { %v962_v24 = vadd.f32 -5.6925062e-05, %v930_v56  ;;  %v868_v20 = vmul.f32 %v836_v21, %v3418_v35  ;;  %v678_v39 = vmul.f32 0.70710677, %v3433_v57  ;;  %v1118_v16 = vmul.f32 %v1086_v8, %v3294_v12 }
 0x14a   : > { %3991 = vst [vmem:[#allocation30_spill] sm:$0xff] %v3445_v10  ;;  %v1087_v3 = vadd.f32 -0.0029546001, %v1055_v0  ;;  %v1024_v45 = vadd.f32 -0.00073499064, %v992_v62  ;;  %v993_v50 = vmul.f32 %v961_v36, %v3351_v18  ;;  %v3466_v21 = vadd.f32 %v617_v22, %v3019_v63  ;;  %v533_v36 = vpop.f32.mrf.mxu0 }
 0x14b   : > { %3992 = vst [vmem:[#allocation31_spill] sm:$0xff] %v3448_v38  ;;  %v805_v29 = vmul.f32 -2.7261424e-10, %v3452_v23  ;;  %v899_v38 = vadd.f32 -2.101024e-06, %v867_v7  ;;  %v3462_v10 = vclamps-f32 %v678_v39, 4.0 }
 0x14c   : > { %3993 = vst [vmem:[#allocation32_spill] sm:$0xff] %v3455_v53  ;;  %v679_v17 = vmul.f32 0.70710677, %v3441_v37  ;;  %v1149_v41 = vadd.f32 -0.016096033, %v1117_v48  ;;  %v994_v53 = vmul.f32 %v962_v24, %v3369_v31  ;;  %v3470_v8 = vmul.f32 0.5, %v3379_v1 }
 0x14d   : > { %v900_v56 = vadd.f32 -2.101024e-06, %v868_v20  ;;  %v837_v44 = vadd.f32 2.7706815e-08, %v805_v29  ;;  %v3474_v0 = vmul.f32 %v3462_v10, %v3462_v10  ;;  %v1150_v7 = vadd.f32 -0.016096033, %v1118_v16 }
 0x14e   : > { %3994 = vst [vmem:[#allocation33_spill] sm:$0xff] %v3470_v8  ;;  %v3476_v62 = vclamps-f32 %v679_v17, 4.0  ;;  %v1119_v48 = vmul.f32 %v1087_v3, %v3318_v14  ;;  %v1056_v20 = vmul.f32 %v1024_v45, %v3334_v34  ;;  %v1025_v22 = vadd.f32 -0.00073499064, %v993_v50  ;;  %v562_v8 = vpop.f32.mrf.mxu1 }
 0x14f   : > { %v869_v39 = vmul.f32 %v837_v44, %v3452_v23  ;;  %v931_v24 = vmul.f32 %v899_v38, %v3391_v15  ;;  %v806_v1 = vmul.f32 -2.7261424e-10, %v3474_v0  ;;  %v932_v17 = vmul.f32 %v900_v56, %v3418_v35 }
 0x150   : > { %v3485_v29 = vmul.f32 %v3476_v62, %v3476_v62  ;;  %v680_v16 = vmul.f32 0.70710677, %v3466_v21  ;;  %v3490_v3 = vadd.f32 %v533_v36, %v3003_v51  ;;  %v3493_v44 = vmul.f32 %v3267_v54, %v1149_v41 }
 0x151   : > { %v901_v40 = vadd.f32 -2.101024e-06, %v869_v39  ;;  %v1026_v45 = vadd.f32 -0.00073499064, %v994_v53  ;;  %v838_v38 = vadd.f32 2.7706815e-08, %v806_v1  ;;  %v3500_v56 = vadd.f32 %v562_v8, %v3005_v52 }
 0x152   : > { %3995 = vst [vmem:[#allocation34_spill] sm:$0xff] %v3493_v44  ;;  %v807_v50 = vmul.f32 -2.7261424e-10, %v3485_v29  ;;  %v1088_v5 = vadd.f32 -0.0029546001, %v1056_v20  ;;  %v3497_v19 = vclamps-f32 %v680_v16, 4.0  ;;  %v1057_v39 = vmul.f32 %v1025_v22, %v3351_v18 }
 0x153   : > { %v933_v60 = vmul.f32 %v901_v40, %v3452_v23  ;;  %3997 = vst [vmem:[#allocation36_spill] sm:$0xff] %v3500_v56  ;;  %v963_v28 = vadd.f32 -5.6925062e-05, %v931_v24  ;;  %v870_v36 = vmul.f32 %v838_v38, %v3474_v0  ;;  %v1151_v54 = vadd.f32 -0.016096033, %v1119_v48 }
 0x154   : > { %3996 = vst [vmem:[#allocation35_spill] sm:$0xff] %v3497_v19  ;;  %v839_v14 = vadd.f32 2.7706815e-08, %v807_v50  ;;  %v964_v41 = vadd.f32 -5.6925062e-05, %v932_v17  ;;  %v3506_v53 = vmul.f32 %v3497_v19, %v3497_v19  ;;  %v1058_v40 = vmul.f32 %v1026_v45, %v3369_v31 }
 0x155   : > { %v681_v20 = vmul.f32 0.70710677, %v3490_v3  ;;  %v965_v1 = vadd.f32 -5.6925062e-05, %v933_v60  ;;  %v902_v16 = vadd.f32 -2.101024e-06, %v870_v36  ;;  %v3512_v22 = vmul.f32 %v3285_v58, %v1150_v7 }
 0x156   : > { %v871_v8 = vmul.f32 %v839_v14, %v3485_v29  ;;  %v808_v24 = vmul.f32 -2.7261424e-10, %v3506_v53  ;;  %v682_v48 = vmul.f32 0.70710677, %v3500_v56  ;;  %v1089_v17 = vadd.f32 -0.0029546001, %v1057_v39 }
 0x157   : > { %3998 = vst [vmem:[#allocation37_spill] sm:$0xff] %v3512_v22  ;;  %v3515_v38 = vclamps-f32 %v681_v20, 4.0  ;;  %v995_v50 = vmul.f32 %v963_v28, %v3391_v15  ;;  %v934_v44 = vmul.f32 %v902_v16, %v3474_v0  ;;  %v996_v60 = vmul.f32 %v964_v41, %v3418_v35  ;;  %v591_v28 = vpop.f32.mrf.mxu2 }
 0x158   : > { %v903_v19 = vadd.f32 -2.101024e-06, %v871_v8  ;;  %v840_v45 = vadd.f32 2.7706815e-08, %v808_v24  ;;  %v3525_v58 = vclamps-f32 %v682_v48, 4.0  ;;  %v1585_v39 = vpack.c.bf16 %v3270_v46, %v3170_v4 }
 0x159   : > { %v3523_v14 = vmul.f32 %v3515_v38, %v3515_v38  ;;  %v1090_v7 = vadd.f32 -0.0029546001, %v1058_v40  ;;  %v966_v36 = vadd.f32 -5.6925062e-05, %v934_v44  ;;  %v997_v16 = vmul.f32 %v965_v1, %v3452_v23 }
 0x15a   : > { %v935_v20 = vmul.f32 %v903_v19, %v3485_v29  ;;  %v872_v8 = vmul.f32 %v840_v45, %v3506_v53  ;;  %v3535_v24 = vmul.f32 %v3525_v58, %v3525_v58  ;;  %v1027_v48 = vadd.f32 -0.00073499064, %v995_v50  ;;  %1869 = vmatmul.bf16.vlgmr.msrb.gmra.mxu0 %v1585_v39 }
 0x15b   : > { %v809_v41 = vmul.f32 -2.7261424e-10, %v3523_v14  ;;  %v3538_v40 = vmul.f32 0.5, %v3399_v27  ;;  %v1586_v4 = vpack.c.bf16 %v3321_v9, %v3181_v33  ;;  %v1028_v19 = vadd.f32 -0.00073499064, %v996_v60 }
 0x15c   : > { %v967_v44 = vadd.f32 -5.6925062e-05, %v935_v20  ;;  %v904_v46 = vadd.f32 -2.101024e-06, %v872_v8  ;;  %v3543_v45 = vadd.f32 %v591_v28, %v3015_v61  ;;  %v3546_v56 = vmul.f32 %v3309_v59, %v1151_v54  ;;  %v620_v20 = vpop.f32.mrf.mxu3 }
 0x15d   : > { %v841_v1 = vadd.f32 2.7706815e-08, %v809_v41  ;;  %v1120_v22 = vmul.f32 %v1088_v5, %v3334_v34  ;;  %v998_v50 = vmul.f32 %v966_v36, %v3474_v0  ;;  %v810_v27 = vmul.f32 -2.7261424e-10, %v3535_v24  ;;  %1898 = vmatmul.bf16.vlgmr.msrb.gmra.mxu1 %v1586_v4  ;;  %v535_v4 = vpop.f32.mrf.mxu0 }
 0x15e   : > { %3999 = vst [vmem:[#allocation38_spill] sm:$0xff] %v3543_v45  ;;  %v1121_v39 = vmul.f32 %v1089_v17, %v3351_v18  ;;  %v1122_v33 = vmul.f32 %v1090_v7, %v3369_v31  ;;  %v1029_v9 = vadd.f32 -0.00073499064, %v997_v16  ;;  %v999_v60 = vmul.f32 %v967_v44, %v3485_v29 }
 0x15f   : > { %v1059_v28 = vmul.f32 %v1027_v48, %v3391_v15  ;;  %v936_v59 = vmul.f32 %v904_v46, %v3506_v53  ;;  %v842_v54 = vadd.f32 2.7706815e-08, %v810_v27  ;;  %v683_v5 = vmul.f32 0.70710677, %v3543_v45 }
 0x160   : > { %v1060_v36 = vmul.f32 %v1028_v19, %v3418_v35  ;;  %v3559_v8 = vmul.f32 0.5, %v3433_v57  ;;  %v873_v41 = vmul.f32 %v841_v1, %v3523_v14  ;;  %v3563_v17 = vadd.f32 %v620_v20, %v3019_v63 }
 0x161   : > { %v1152_v7 = vadd.f32 -0.016096033, %v1120_v22  ;;  %v1030_v16 = vadd.f32 -0.00073499064, %v998_v50  ;;  %v874_v44 = vmul.f32 %v842_v54, %v3535_v24  ;;  %v3566_v48 = vclamps-f32 %v683_v5, 4.0 }
 0x162   : > { %4000 = vst [vmem:[#allocation39_spill] sm:$0xff] %v3559_v8  ;;  %v1153_v46 = vadd.f32 -0.016096033, %v1121_v39  ;;  %v1061_v27 = vmul.f32 %v1029_v9, %v3452_v23  ;;  %v3570_v19 = vmul.f32 0.5, %v3441_v37  ;;  %v1031_v57 = vadd.f32 -0.00073499064, %v999_v60 }
 0x163   : > { %4001 = vst [vmem:[#allocation40_spill] sm:$0xff] %v3563_v17  ;;  %v1154_v45 = vadd.f32 -0.016096033, %v1122_v33  ;;  %v1091_v8 = vadd.f32 -0.0029546001, %v1059_v28  ;;  %v3574_v20 = vmul.f32 %v3566_v48, %v3566_v48  ;;  %v3578_v5 = vadd.f32 %v535_v4, %v3003_v51 }
 0x164   : > { %4002 = vst [vmem:[#allocation41_spill] sm:$0xff] %v3566_v48  ;;  %v968_v1 = vadd.f32 -5.6925062e-05, %v936_v59  ;;  %v1092_v22 = vadd.f32 -0.0029546001, %v1060_v36  ;;  %v3581_v39 = vmul.f32 %v3324_v6, %v1152_v7  ;;  %v1062_v37 = vmul.f32 %v1030_v16, %v3474_v0 }
 0x165   : > { %v905_v50 = vadd.f32 -2.101024e-06, %v873_v41  ;;  %v684_v54 = vmul.f32 0.70710677, %v3563_v17  ;;  %v906_v9 = vadd.f32 -2.101024e-06, %v874_v44  ;;  %v3586_v60 = vmul.f32 %v3344_v2, %v1153_v46  ;;  %v564_v41 = vpop.f32.mrf.mxu1 }
 0x166   : > { %v811_v33 = vmul.f32 -2.7261424e-10, %v3574_v20  ;;  %v1093_v28 = vadd.f32 -0.0029546001, %v1061_v27  ;;  %v1063_v59 = vmul.f32 %v1031_v57, %v3485_v29  ;;  %v3592_v51 = vmul.f32 %v3359_v47, %v1154_v45 }
 0x167   : > { %v3589_v36 = vclamps-f32 %v684_v54, 4.0  ;;  %v3595_v6 = vmul.f32 0.5, %v3466_v21  ;;  %v1000_v7 = vmul.f32 %v968_v1, %v3506_v53  ;;  %v1123_v44 = vmul.f32 %v1091_v8, %v3391_v15 }
 0x168   : > { %v843_v16 = vadd.f32 2.7706815e-08, %v811_v33  ;;  %v1124_v2 = vmul.f32 %v1092_v22, %v3418_v35  ;;  %v937_v4 = vmul.f32 %v905_v50, %v3523_v14  ;;  %v685_v46 = vmul.f32 0.70710677, %v3578_v5 }
 0x169   : > { %4003 = vst [vmem:[#allocation42_spill] sm:$0xff] %v3589_v36  ;;  %v1094_v27 = vadd.f32 -0.0029546001, %v1062_v37  ;;  %v938_v57 = vmul.f32 %v906_v9, %v3535_v24  ;;  %v3605_v45 = vadd.f32 %v564_v41, %v3005_v52  ;;  %v1125_v21 = vmul.f32 %v1093_v28, %v3452_v23 }
 0x16a   : > { %v875_v47 = vmul.f32 %v843_v16, %v3574_v20  ;;  %v1095_v1 = vadd.f32 -0.0029546001, %v1063_v59  ;;  %v3610_v8 = vmul.f32 %v3589_v36, %v3589_v36  ;;  %v3612_v22 = vclamps-f32 %v685_v46, 4.0  ;;  %v593_v59 = vpop.f32.mrf.mxu2 }
 0x16b   : > { %4004 = vst [vmem:[#allocation43_spill] sm:$0xff] %v3605_v45  ;;  %v1032_v50 = vadd.f32 -0.00073499064, %v1000_v7  ;;  %v3615_v54 = vmul.f32 0.5, %v3490_v3  ;;  %v1587_v9 = vpack.c.bf16 %v3384_v32, %v3235_v49  ;;  %v1155_v33 = vadd.f32 -0.016096033, %v1123_v44 }
 0x16c   : > { %v907_v37 = vadd.f32 -2.101024e-06, %v875_v47  ;;  %v1156_v52 = vadd.f32 -0.016096033, %v1124_v2  ;;  %v969_v41 = vadd.f32 -5.6925062e-05, %v937_v4  ;;  %v3621_v28 = vmul.f32 %v3612_v22, %v3612_v22  ;;  %v622_v2 = vpop.f32.mrf.mxu3 }
 0x16d   : > { %4005 = vst [vmem:[#allocation44_spill] sm:$0xff] %v3615_v54  ;;  %v1126_v16 = vmul.f32 %v1094_v27, %v3474_v0  ;;  %v970_v46 = vadd.f32 -5.6925062e-05, %v938_v57  ;;  %v686_v7 = vmul.f32 0.70710677, %v3605_v45  ;;  %1927 = vmatmul.bf16.vlgmr.msrb.gmra.mxu2 %v1587_v9  ;;  %v1588_v3 = vpack.c.bf16 %v3387_v55, %v3261_v42 }
 0x16e   : > { %v1157_v47 = vadd.f32 -0.016096033, %v1125_v21  ;;  %v1127_v49 = vmul.f32 %v1095_v1, %v3485_v29  ;;  %v812_v32 = vmul.f32 -2.7261424e-10, %v3610_v8  ;;  %v813_v44 = vmul.f32 -2.7261424e-10, %v3621_v28 }
 0x16f   : > { %v1064_v4 = vmul.f32 %v1032_v50, %v3506_v53  ;;  %v939_v17 = vmul.f32 %v907_v37, %v3574_v20  ;;  %v3632_v27 = vclamps-f32 %v686_v7, 4.0  ;;  %1956 = vmatmul.bf16.vlgmr.msrb.gmra.mxu3 %v1588_v3  ;;  %v3635_v57 = vadd.f32 %v593_v59, %v3015_v61 }
 0x170   : > { %v3638_v42 = vmul.f32 %v3376_v13, %v1155_v33  ;;  %v3641_v55 = vmul.f32 %v3409_v26, %v1156_v52  ;;  %v1001_v21 = vmul.f32 %v969_v41, %v3523_v14  ;;  %v845_v1 = vadd.f32 2.7706815e-08, %v813_v44 }
 0x171   : > { %4006 = vst [vmem:[#allocation45_spill] sm:$0xff] %v3635_v57  ;;  %v1158_v9 = vadd.f32 -0.016096033, %v1126_v16  ;;  %v1002_v50 = vmul.f32 %v970_v46, %v3535_v24  ;;  %v3647_v37 = vmul.f32 %v3632_v27, %v3632_v27  ;;  %v3650_v7 = vadd.f32 %v622_v2, %v3019_v63 }
 0x172   : > { %v1159_v61 = vadd.f32 -0.016096033, %v1127_v49  ;;  %v844_v59 = vadd.f32 2.7706815e-08, %v812_v32  ;;  %v877_v13 = vmul.f32 %v845_v1, %v3621_v28  ;;  %v687_v26 = vmul.f32 0.70710677, %v3635_v57 }
 0x173   : > { %4007 = vst [vmem:[#allocation46_spill] sm:$0xff] %v3650_v7  ;;  %v3655_v33 = vmul.f32 %v3437_v30, %v1157_v47  ;;  %v1096_v52 = vadd.f32 -0.0029546001, %v1064_v4  ;;  %v971_v41 = vadd.f32 -5.6925062e-05, %v939_v17  ;;  %v3659_v3 = vmul.f32 0.5, %v3578_v5 }
 0x174   : > { %v814_v16 = vmul.f32 -2.7261424e-10, %v3647_v37  ;;  %v1033_v46 = vadd.f32 -0.00073499064, %v1001_v21  ;;  %v909_v44 = vadd.f32 -2.101024e-06, %v877_v13  ;;  %v3664_v49 = vmul.f32 %v3462_v10, %v1158_v9 }
 0x175   : > { %4008 = vst [vmem:[#allocation47_spill] sm:$0xff] %v3659_v3  ;;  %v3661_v63 = vclamps-f32 %v687_v26, 4.0  ;;  %v1034_v32 = vadd.f32 -0.00073499064, %v1002_v50  ;;  %v688_v1 = vmul.f32 0.70710677, %v3650_v7  ;;  %v876_v30 = vmul.f32 %v844_v59, %v3610_v8 }
 0x176   : > { %v846_v2 = vadd.f32 2.7706815e-08, %v814_v16  ;;  %v941_v17 = vmul.f32 %v909_v44, %v3621_v28  ;;  %v1209_v5 = vmul.f32 -1.45660715e-05, %v3189_v43  ;;  %v1003_v4 = vmul.f32 %v971_v41, %v3574_v20 }
 0x177   : > { %4009 = vst [vmem:[#allocation48_spill] sm:$0xff] %v3661_v63  ;;  %v3671_v47 = vmul.f32 %v3661_v63, %v3661_v63  ;;  %v3676_v10 = vclamps-f32 %v688_v1, 4.0  ;;  %v1213_v9 = vmul.f32 -1.45660715e-05, %v3276_v11  ;;  %v3680_v50 = vmul.f32 %v3476_v62, %v1159_v61 }
 0x178   : > { %v878_v21 = vmul.f32 %v846_v2, %v3647_v37  ;;  %v1065_v59 = vmul.f32 %v1033_v46, %v3523_v14  ;;  %v973_v13 = vadd.f32 -5.6925062e-05, %v941_v17  ;;  %v1066_v16 = vmul.f32 %v1034_v32, %v3535_v24 }
 0x179   : > { %4010 = vst [vmem:[#allocation49_spill] sm:$0xff] %v3676_v10  ;;  %v815_v26 = vmul.f32 -2.7261424e-10, %v3671_v47  ;;  %v3687_v41 = vmul.f32 %v3676_v10, %v3676_v10  ;;  %v1241_v2 = vadd.f32 -0.00021337405, %v1209_v5  ;;  %v1128_v5 = vmul.f32 %v1096_v52, %v3506_v53 }
 0x17a   : > { %v910_v44 = vadd.f32 -2.101024e-06, %v878_v21  ;;  %v908_v1 = vadd.f32 -2.101024e-06, %v876_v30  ;;  %v1005_v7 = vmul.f32 %v973_v13, %v3621_v28  ;;  %v1245_v36 = vadd.f32 -0.00021337405, %v1213_v9 }
 0x17b   : > { %v847_v57 = vadd.f32 2.7706815e-08, %v815_v26  ;;  %v1035_v62 = vadd.f32 -0.00073499064, %v1003_v4  ;;  %v816_v46 = vmul.f32 -2.7261424e-10, %v3687_v41  ;;  %v1273_v17 = vmul.f32 %v1241_v2, %v3189_v43 }
 0x17c   : > { %v942_v61 = vmul.f32 %v910_v44, %v3647_v37  ;;  %v1097_v45 = vadd.f32 -0.0029546001, %v1065_v59  ;;  %v1037_v32 = vadd.f32 -0.00073499064, %v1005_v7  ;;  %v1277_v10 = vmul.f32 %v1245_v36, %v3276_v11 }
 0x17d   : > { %v879_v21 = vmul.f32 %v847_v57, %v3671_v47  ;;  %v848_v63 = vadd.f32 2.7706815e-08, %v816_v46  ;;  %v1305_v13 = vadd.f32 -0.001682827, %v1273_v17  ;;  %v1098_v26 = vadd.f32 -0.0029546001, %v1066_v16 }
 0x17e   : > { %v974_v30 = vadd.f32 -5.6925062e-05, %v942_v61  ;;  %v940_v4 = vmul.f32 %v908_v1, %v3610_v8  ;;  %v1309_v44 = vadd.f32 -0.001682827, %v1277_v10  ;;  %v1067_v48 = vmul.f32 %v1035_v62, %v3574_v20 }
 0x17f   : > { %v911_v9 = vadd.f32 -2.101024e-06, %v879_v21  ;;  %v880_v7 = vmul.f32 %v848_v63, %v3687_v41  ;;  %v1337_v57 = vmul.f32 %v1305_v13, %v3189_v43  ;;  %v1069_v36 = vmul.f32 %v1037_v32, %v3621_v28 }
 0x180   : > { %v1006_v2 = vmul.f32 %v974_v30, %v3647_v37  ;;  %v1341_v59 = vmul.f32 %v1309_v44, %v3276_v11  ;;  %v1210_v16 = vmul.f32 -1.45660715e-05, %v3214_v25  ;;  %v1129_v1 = vmul.f32 %v1097_v45, %v3523_v14 }
 0x181   : > { %v943_v52 = vmul.f32 %v911_v9, %v3671_v47  ;;  %v912_v10 = vadd.f32 -2.101024e-06, %v880_v7  ;;  %v1369_v46 = vadd.f32 -0.0073733293, %v1337_v57  ;;  %v1130_v62 = vmul.f32 %v1098_v26, %v3535_v24 }
 0x182   : > { %v1038_v61 = vadd.f32 -0.00073499064, %v1006_v2  ;;  %v972_v17 = vadd.f32 -5.6925062e-05, %v940_v4  ;;  %v1373_v63 = vadd.f32 -0.0073733293, %v1341_v59 }
 0x183   : > { %v975_v21 = vadd.f32 -5.6925062e-05, %v943_v52  ;;  %v1099_v30 = vadd.f32 -0.0029546001, %v1067_v48  ;;  %v1401_v32 = vmul.f32 %v1369_v46, %v3189_v43  ;;  %v1214_v9 = vmul.f32 -1.45660715e-05, %v3294_v12 }
 0x184   : > { %v1070_v13 = vmul.f32 %v1038_v61, %v3647_v37  ;;  %v1160_v44 = vadd.f32 -0.016096033, %v1128_v5  ;;  %v1101_v3 = vadd.f32 -0.0029546001, %v1069_v36  ;;  %v1405_v54 = vmul.f32 %v1373_v63, %v3276_v11 }
 0x185   : > { %v1242_v45 = vadd.f32 -0.00021337405, %v1210_v16  ;;  %v1161_v2 = vadd.f32 -0.016096033, %v1129_v1  ;;  %v1007_v7 = vmul.f32 %v975_v21, %v3671_v47  ;;  %v944_v26 = vmul.f32 %v912_v10, %v3687_v41  ;;  %v4011_v16 = vld [vmem:[#allocation16_spill] sm:$0xff]  ;;  %v4012_v10 = vld [vmem:[#allocation35_spill] sm:$0xff] }
 0x186   : > { %v1433_v4 = vadd.f32 -0.014264739, %v1401_v32  ;;  %v1162_v57 = vadd.f32 -0.016096033, %v1130_v62  ;;  %v1004_v48 = vmul.f32 %v972_v17, %v3610_v8  ;;  %v1437_v52 = vadd.f32 -0.014264739, %v1405_v54 }
 0x187   : > { %v1246_v59 = vadd.f32 -0.00021337405, %v1214_v9  ;;  %v1131_v43 = vmul.f32 %v1099_v30, %v3574_v20  ;;  %v1102_v61 = vadd.f32 -0.0029546001, %v1070_v13  ;;  %v1274_v5 = vmul.f32 %v1242_v45, %v3214_v25  ;;  %v4014_v13 = vld [vmem:[#allocation21_spill] sm:$0xff] }
 0x188   : > { %2579 = vrcp.f32 %v1433_v4  ;;  %v1133_v11 = vmul.f32 %v1101_v3, %v3621_v28  ;;  %v1211_v1 = vmul.f32 -1.45660715e-05, %v4011_v16  ;;  %v3720_v46 = vmul.f32 %v4012_v10, %v1160_v44 }
 0x189   : > { %2581 = vrcp.f32 %v1437_v52  ;;  %v1278_v36 = vmul.f32 %v1246_v59, %v3294_v12  ;;  %v1039_v62 = vadd.f32 -0.00073499064, %v1007_v7  ;;  %v976_v17 = vadd.f32 -5.6925062e-05, %v944_v26 }
 0x18a   : > { %v1306_v54 = vadd.f32 -0.001682827, %v1274_v5  ;;  %v3723_v21 = vmul.f32 %v3515_v38, %v1161_v2  ;;  %v3726_v63 = vmul.f32 %v3525_v58, %v1162_v57  ;;  %v1215_v3 = vmul.f32 -1.45660715e-05, %v4014_v13 }
 0x18b   : > { %v1310_v30 = vadd.f32 -0.001682827, %v1278_v36  ;;  %v1036_v32 = vadd.f32 -0.00073499064, %v1004_v48  ;;  %v1134_v9 = vmul.f32 %v1102_v61, %v3647_v37  ;;  %v1243_v4 = vadd.f32 -0.00021337405, %v1211_v1 }
 0x18c   : > { %4013 = vst [vmem:[#allocation16_spill] sm:$0xff] %v3726_v63  ;;  %v1338_v45 = vmul.f32 %v1306_v54, %v3214_v25  ;;  %v3731_v44 = vadd.f32 -0.016096033, %v1131_v43  ;;  %v3733_v7 = vadd.f32 -0.016096033, %v1133_v11  ;;  %v1071_v58 = vmul.f32 %v1039_v62, %v3671_v47  ;;  %v4016_v61 = vld [vmem:[#allocation24_spill] sm:$0xff] }
 0x18d   : > { %v1342_v26 = vmul.f32 %v1310_v30, %v3294_v12  ;;  %v1247_v38 = vadd.f32 -0.00021337405, %v1215_v3  ;;  %v1008_v57 = vmul.f32 %v976_v17, %v3687_v41  ;;  %v1275_v48 = vmul.f32 %v1243_v4, %v4011_v16  ;;  %v4017_v1 = vld [vmem:[#allocation17_spill] sm:$0xff]  ;;  %v4018_v54 = vld [vmem:[#allocation34_spill] sm:$0xff] }
 0x18e   : > { %4015 = vst [vmem:[#allocation35_spill] sm:$0xff] %v3731_v44  ;;  %v2580_v2 = vpop.eup %2579  ;;  %v1370_v52 = vadd.f32 -0.0073733293, %v1338_v45  ;;  %v1212_v11 = vmul.f32 -1.45660715e-05, %v4017_v1 }
 0x18f   : > { %v2582_v59 = vpop.eup %2581  ;;  %v1497_v5 = vmul.f32 %v2580_v2, %v4016_v61  ;;  %v1374_v36 = vadd.f32 -0.0073733293, %v1342_v26  ;;  %v1279_v43 = vmul.f32 %v1247_v38, %v4014_v13  ;;  %v3742_v10 = vadd.f32 -0.016096033, %v1134_v9 }
 0x190   : > { %v1501_v30 = vmul.f32 %v2582_v59, %v4018_v54  ;;  %v1402_v3 = vmul.f32 %v1370_v52, %v3214_v25  ;;  %v1307_v62 = vadd.f32 -0.001682827, %v1275_v48  ;;  %v1216_v4 = vmul.f32 -1.45660715e-05, %v3334_v34  ;;  %v4019_v25 = vld [vmem:[#allocation15_spill] sm:$0xff]  ;;  %v4020_v48 = vld [vmem:[#allocation22_spill] sm:$0xff] }
 0x191   : > { %v1529_v63 = vadd.f32 1.0, %v1497_v5  ;;  %v1406_v17 = vmul.f32 %v1374_v36, %v3294_v12  ;;  %v1311_v45 = vadd.f32 -0.001682827, %v1279_v43  ;;  %v3748_v44 = vadd.f32 -0.00073499064, %v1008_v57 }
 0x192   : > { %v1533_v26 = vadd.f32 1.0, %v1501_v30  ;;  %v1434_v2 = vadd.f32 -0.014264739, %v1402_v3  ;;  %v1339_v38 = vmul.f32 %v1307_v62, %v4011_v16  ;;  %v3751_v61 = vadd.f32 -0.0029546001, %v1071_v58 }
 0x193   : > { %v1438_v9 = vadd.f32 -0.014264739, %v1406_v17  ;;  %v1343_v59 = vmul.f32 %v1311_v45, %v4014_v13  ;;  %v1244_v54 = vadd.f32 -0.00021337405, %v1212_v11  ;;  %v1561_v52 = vmul.f32 %v1529_v63, %v4019_v25 }
 0x194   : > { %v1565_v5 = vmul.f32 %v1533_v26, %v4020_v48  ;;  %2583 = vrcp.f32 %v1434_v2  ;;  %v1371_v12 = vadd.f32 -0.0073733293, %v1339_v38  ;;  %v1248_v57 = vadd.f32 -0.00021337405, %v1216_v4 }
 0x195   : > { %2585 = vrcp.f32 %v1438_v9  ;;  %v1375_v36 = vadd.f32 -0.0073733293, %v1343_v59  ;;  %v1276_v43 = vmul.f32 %v1244_v54, %v4017_v1  ;;  %v1217_v58 = vmul.f32 -1.45660715e-05, %v3351_v18 }
 0x196   : > { %v1589_v30 = vpack.c.bf16 %v1565_v5, %v1561_v52  ;;  %v1403_v3 = vmul.f32 %v1371_v12, %v4011_v16  ;;  %v1221_v62 = vmul.f32 -1.45660715e-05, %v3452_v23  ;;  %v1280_v63 = vmul.f32 %v1248_v57, %v3334_v34 }
 0x197   : > { %v1407_v11 = vmul.f32 %v1375_v36, %v4014_v13  ;;  %v1308_v17 = vadd.f32 -0.001682827, %v1276_v43  ;;  %v1218_v45 = vmul.f32 -1.45660715e-05, %v3369_v31  ;;  %v3764_v26 = vmul.f32 %v1036_v32, %v3610_v8  ;;  %v4021_v32 = vld [vmem:[#allocation27_spill] sm:$0xff]  ;;  %v4022_v43 = vld [vmem:[#allocation37_spill] sm:$0xff] }
 0x198   : > { %1874 = vmatmul.bf16.gmra.mxu0 %v1589_v30  ;;  %v1435_v4 = vadd.f32 -0.014264739, %v1403_v3  ;;  %v1249_v2 = vadd.f32 -0.00021337405, %v1217_v58  ;;  %v1253_v38 = vadd.f32 -0.00021337405, %v1221_v62 }
 0x199   : > { %v1439_v9 = vadd.f32 -0.014264739, %v1407_v11  ;;  %v1312_v16 = vadd.f32 -0.001682827, %v1280_v63  ;;  %v1340_v59 = vmul.f32 %v1308_v17, %v4017_v1  ;;  %v1222_v54 = vmul.f32 -1.45660715e-05, %v3474_v0 }
 0x19a   : > { %v2584_v25 = vpop.eup %2583  ;;  %2587 = vrcp.f32 %v1435_v4  ;;  %v1281_v13 = vmul.f32 %v1249_v2, %v3351_v18  ;;  %v1285_v52 = vmul.f32 %v1253_v38, %v3452_v23  ;;  %v1250_v48 = vadd.f32 -0.00021337405, %v1218_v45 }
 0x19b   : > { %v2586_v5 = vpop.eup %2585  ;;  %v1498_v12 = vmul.f32 %v2584_v25, %v4021_v32  ;;  %2589 = vrcp.f32 %v1439_v9  ;;  %v1344_v36 = vmul.f32 %v1312_v16, %v3334_v34  ;;  %v1372_v57 = vadd.f32 -0.0073733293, %v1340_v59  ;;  %v4023_v16 = vld [vmem:[#allocation18_spill] sm:$0xff] }
 0x19c   : > { %v1502_v30 = vmul.f32 %v2586_v5, %v4022_v43  ;;  %v1313_v3 = vadd.f32 -0.001682827, %v1281_v13  ;;  %v1317_v58 = vadd.f32 -0.001682827, %v1285_v52  ;;  %v1254_v62 = vadd.f32 -0.00021337405, %v1222_v54 }
 0x19d   : > { %v1530_v11 = vadd.f32 1.0, %v1498_v12  ;;  %v1376_v63 = vadd.f32 -0.0073733293, %v1344_v36  ;;  %v1404_v17 = vmul.f32 %v1372_v57, %v4017_v1  ;;  %v1282_v4 = vmul.f32 %v1250_v48, %v3369_v31  ;;  %v4024_v5 = vld [vmem:[#allocation23_spill] sm:$0xff]  ;;  %v4025_v57 = vld [vmem:[#allocation28_spill] sm:$0xff] }
 0x19e   : > { %v1534_v2 = vadd.f32 1.0, %v1502_v30  ;;  %v1345_v45 = vmul.f32 %v1313_v3, %v3351_v18  ;;  %v1349_v38 = vmul.f32 %v1317_v58, %v3452_v23  ;;  %v1286_v9 = vmul.f32 %v1254_v62, %v3474_v0 }
 0x19f   : > { %v1562_v59 = vmul.f32 %v1530_v11, %v4023_v16  ;;  %v1408_v25 = vmul.f32 %v1376_v63, %v3334_v34  ;;  %v1436_v13 = vadd.f32 -0.014264739, %v1404_v17  ;;  %v1314_v52 = vadd.f32 -0.001682827, %v1282_v4  ;;  %v4026_v16 = vld [vmem:[#allocation19_spill] sm:$0xff] }
 0x1a0   : > { %v2588_v54 = vpop.eup %2587  ;;  %v1566_v32 = vmul.f32 %v1534_v2, %v4024_v5  ;;  %v1377_v12 = vadd.f32 -0.0073733293, %v1345_v45  ;;  %v1381_v1 = vadd.f32 -0.0073733293, %v1349_v38  ;;  %v1318_v36 = vadd.f32 -0.001682827, %v1286_v9 }
 0x1a1   : > { %v2590_v48 = vpop.eup %2589  ;;  %v1499_v43 = vmul.f32 %v2588_v54, %v4025_v57  ;;  %v1440_v30 = vadd.f32 -0.014264739, %v1408_v25  ;;  %2591 = vrcp.f32 %v1436_v13  ;;  %v1346_v3 = vmul.f32 %v1314_v52, %v3369_v31  ;;  %v4027_v25 = vld [vmem:[#allocation25_spill] sm:$0xff] }
 0x1a2   : > { %v1590_v58 = vpack.c.bf16 %v1566_v32, %v1562_v59  ;;  %v1503_v62 = vmul.f32 %v2590_v48, %v3546_v56  ;;  %v1409_v34 = vmul.f32 %v1377_v12, %v3351_v18  ;;  %v1413_v11 = vmul.f32 %v1381_v1, %v3452_v23  ;;  %v4028_v1 = vld [vmem:[#allocation32_spill] sm:$0xff] }
 0x1a3   : > { %v1531_v63 = vadd.f32 1.0, %v1499_v43  ;;  %2593 = vrcp.f32 %v1440_v30  ;;  %v1350_v17 = vmul.f32 %v1318_v36, %v3474_v0  ;;  %v1378_v4 = vadd.f32 -0.0073733293, %v1346_v3 }
 0x1a4   : > { %v3789_v2 = vmul.f32 %v3612_v22, %v3733_v7  ;;  %1903 = vmatmul.bf16.gmra.mxu1 %v1590_v58  ;;  %v1535_v45 = vadd.f32 1.0, %v1503_v62  ;;  %v1441_v38 = vadd.f32 -0.014264739, %v1409_v34  ;;  %v1445_v9 = vadd.f32 -0.014264739, %v1413_v11 }
 0x1a5   : > { %v1563_v59 = vmul.f32 %v1531_v63, %v4026_v16  ;;  %v1382_v56 = vadd.f32 -0.0073733293, %v1350_v17  ;;  %v1410_v18 = vmul.f32 %v1378_v4, %v3369_v31  ;;  %v1219_v23 = vmul.f32 -1.45660715e-05, %v3391_v15 }
 0x1a6   : > { %v1567_v13 = vmul.f32 %v1535_v45, %v4027_v25  ;;  %2595 = vrcp.f32 %v1441_v38  ;;  %v1223_v52 = vmul.f32 -1.45660715e-05, %v3485_v29  ;;  %v1220_v54 = vmul.f32 -1.45660715e-05, %v3418_v35  ;;  %v4029_v38 = vld [vmem:[#allocation20_spill] sm:$0xff] }
 0x1a7   : > { %v2592_v22 = vpop.eup %2591  ;;  %2597 = vrcp.f32 %v1445_v9  ;;  %v1414_v7 = vmul.f32 %v1382_v56, %v3474_v0  ;;  %v1442_v5 = vadd.f32 -0.014264739, %v1410_v18  ;;  %v1251_v32 = vadd.f32 -0.00021337405, %v1219_v23 }
 0x1a8   : > { %v1591_v12 = vpack.c.bf16 %v1567_v13, %v1563_v59  ;;  %v1500_v36 = vmul.f32 %v2592_v22, %v4028_v1  ;;  %v1255_v48 = vadd.f32 -0.00021337405, %v1223_v52  ;;  %v1224_v31 = vmul.f32 -1.45660715e-05, %v3506_v53  ;;  %v4030_v13 = vld [vmem:[#allocation26_spill] sm:$0xff] }
 0x1a9   : > { %v2594_v57 = vpop.eup %2593  ;;  %v1446_v43 = vadd.f32 -0.014264739, %v1414_v7  ;;  %2599 = vrcp.f32 %v1442_v5  ;;  %v1283_v30 = vmul.f32 %v1251_v32, %v3391_v15  ;;  %v1252_v3 = vadd.f32 -0.00021337405, %v1220_v54 }
 0x1aa   : > { %1932 = vmatmul.bf16.gmra.mxu2 %v1591_v12  ;;  %v1504_v58 = vmul.f32 %v2594_v57, %v3581_v39  ;;  %v1532_v62 = vadd.f32 1.0, %v1500_v36  ;;  %v1287_v0 = vmul.f32 %v1255_v48, %v3485_v29  ;;  %v1256_v34 = vadd.f32 -0.00021337405, %v1224_v31 }
 0x1ab   : > { %2601 = vrcp.f32 %v1446_v43  ;;  %v1315_v11 = vadd.f32 -0.001682827, %v1283_v30  ;;  %v1284_v63 = vmul.f32 %v1252_v3, %v3418_v35  ;;  %v1225_v17 = vmul.f32 -1.45660715e-05, %v3523_v14  ;;  %v4031_v30 = vld [vmem:[#allocation29_spill] sm:$0xff] }
 0x1ac   : > { %v2596_v4 = vpop.eup %2595  ;;  %v1536_v45 = vadd.f32 1.0, %v1504_v58  ;;  %v1564_v9 = vmul.f32 %v1532_v62, %v4029_v38  ;;  %v1319_v16 = vadd.f32 -0.001682827, %v1287_v0  ;;  %v1288_v59 = vmul.f32 %v1256_v34, %v3506_v53 }
 0x1ad   : > { %v2598_v56 = vpop.eup %2597  ;;  %v1505_v39 = vmul.f32 %v2596_v4, %v3586_v60  ;;  %v1347_v18 = vmul.f32 %v1315_v11, %v3391_v15  ;;  %v1316_v23 = vadd.f32 -0.001682827, %v1284_v63  ;;  %v1229_v25 = vmul.f32 -1.45660715e-05, %v3621_v28 }
 0x1ae   : > { %v1568_v52 = vmul.f32 %v1536_v45, %v4030_v13  ;;  %v1509_v54 = vmul.f32 %v2598_v56, %v3655_v33  ;;  %v1351_v22 = vmul.f32 %v1319_v16, %v3485_v29  ;;  %v1320_v7 = vadd.f32 -0.001682827, %v1288_v59  ;;  %v4032_v16 = vld [vmem:[#allocation30_spill] sm:$0xff] }
 0x1af   : > { %v2600_v5 = vpop.eup %2599  ;;  %v1537_v32 = vadd.f32 1.0, %v1505_v39  ;;  %v1379_v12 = vadd.f32 -0.0073733293, %v1347_v18  ;;  %v1348_v1 = vmul.f32 %v1316_v23, %v3418_v35  ;;  %v1257_v36 = vadd.f32 -0.00021337405, %v1225_v17 }
 0x1b0   : > { %v1592_v48 = vpack.c.bf16 %v1568_v52, %v1564_v9  ;;  %v1541_v60 = vadd.f32 1.0, %v1509_v54  ;;  %v1506_v31 = vmul.f32 %v2600_v5, %v3592_v51  ;;  %v1383_v57 = vadd.f32 -0.0073733293, %v1351_v22 }
 0x1b1   : > { %v2602_v43 = vpop.eup %2601  ;;  %v1569_v3 = vmul.f32 %v1537_v32, %v4031_v30  ;;  %v1411_v58 = vmul.f32 %v1379_v12, %v3391_v15  ;;  %v1352_v33 = vmul.f32 %v1320_v7, %v3506_v53  ;;  %v1380_v62 = vadd.f32 -0.0073733293, %v1348_v1 }
 0x1b2   : > { %1961 = vmatmul.bf16.gmra.mxu3 %v1592_v48  ;;  %v1573_v0 = vmul.f32 %v1541_v60, %v3538_v40  ;;  %v1510_v34 = vmul.f32 %v2602_v43, %v3664_v49  ;;  %v1538_v11 = vadd.f32 1.0, %v1506_v31  ;;  %v1415_v63 = vmul.f32 %v1383_v57, %v3485_v29  ;;  %v4033_v49 = vld [vmem:[#allocation39_spill] sm:$0xff] }
 0x1b3   : > { %v1443_v17 = vadd.f32 -0.014264739, %v1411_v58  ;;  %v1384_v4 = vadd.f32 -0.0073733293, %v1352_v33  ;;  %v1412_v51 = vmul.f32 %v1380_v62, %v3418_v35  ;;  %v1261_v45 = vadd.f32 -0.00021337405, %v1229_v25 }
 0x1b4   : > { %v1593_v38 = vpack.c.bf16 %v1573_v0, %v1569_v3  ;;  %v1542_v9 = vadd.f32 1.0, %v1510_v34  ;;  %v1570_v15 = vmul.f32 %v1538_v11, %v4032_v16  ;;  %v1447_v59 = vadd.f32 -0.014264739, %v1415_v63 }
 0x1b5   : > { %2603 = vrcp.f32 %v1443_v17  ;;  %v1416_v56 = vmul.f32 %v1384_v4, %v3506_v53  ;;  %v1444_v39 = vadd.f32 -0.014264739, %v1412_v51  ;;  %v1289_v40 = vmul.f32 %v1257_v36, %v3523_v14 }
 0x1b6   : > { %1879 = vmatmul.bf16.gmra.mxu0 %v1593_v38  ;;  %v1574_v18 = vmul.f32 %v1542_v9, %v4033_v49  ;;  %2605 = vrcp.f32 %v1447_v59  ;;  %v1293_v29 = vmul.f32 %v1261_v45, %v3621_v28  ;;  %v1226_v35 = vmul.f32 -1.45660715e-05, %v3535_v24 }
 0x1b7   : > { %v1448_v23 = vadd.f32 -0.014264739, %v1416_v56  ;;  %2607 = vrcp.f32 %v1444_v39  ;;  %v1321_v25 = vadd.f32 -0.001682827, %v1289_v40  ;;  %v1230_v13 = vmul.f32 -1.45660715e-05, %v3647_v37 }
 0x1b8   : > { %v1594_v52 = vpack.c.bf16 %v1574_v18, %v1570_v15  ;;  %v1325_v54 = vadd.f32 -0.001682827, %v1293_v29  ;;  %v1258_v22 = vadd.f32 -0.00021337405, %v1226_v35  ;;  %v1227_v53 = vmul.f32 -1.45660715e-05, %v3574_v20 }
 0x1b9   : > { %2609 = vrcp.f32 %v1448_v23  ;;  %v1353_v7 = vmul.f32 %v1321_v25, %v3523_v14  ;;  %v1262_v5 = vadd.f32 -0.00021337405, %v1230_v13  ;;  %v1231_v32 = vmul.f32 -1.45660715e-05, %v3671_v47  ;;  %v4034_v39 = vld [vmem:[#allocation31_spill] sm:$0xff]  ;;  %v4035_v35 = vld [vmem:[#allocation33_spill] sm:$0xff] }
 0x1ba   : > { %1908 = vmatmul.bf16.gmra.mxu1 %v1594_v52  ;;  %v1357_v12 = vmul.f32 %v1325_v54, %v3621_v28  ;;  %v1290_v1 = vmul.f32 %v1258_v22, %v3535_v24  ;;  %v1259_v36 = vadd.f32 -0.00021337405, %v1227_v53  ;;  %v1228_v48 = vmul.f32 -1.45660715e-05, %v3610_v8 }
 0x1bb   : > { %v2604_v60 = vpop.eup %2603  ;;  %v1385_v31 = vadd.f32 -0.0073733293, %v1353_v7  ;;  %v1294_v57 = vmul.f32 %v1262_v5, %v3647_v37  ;;  %v1263_v43 = vadd.f32 -0.00021337405, %v1231_v32  ;;  %v1232_v30 = vmul.f32 -1.45660715e-05, %v3687_v41 }
 0x1bc   : > { %v2606_v3 = vpop.eup %2605  ;;  %v1507_v58 = vmul.f32 %v2604_v60, %v3638_v42  ;;  %v1389_v33 = vadd.f32 -0.0073733293, %v1357_v12  ;;  %v1322_v62 = vadd.f32 -0.001682827, %v1290_v1  ;;  %v1291_v0 = vmul.f32 %v1259_v36, %v3574_v20 }
 0x1bd   : > { %v2608_v34 = vpop.eup %2607  ;;  %v1511_v11 = vmul.f32 %v2606_v3, %v3680_v50  ;;  %v1417_v63 = vmul.f32 %v1385_v31, %v3523_v14  ;;  %v1326_v17 = vadd.f32 -0.001682827, %v1294_v57  ;;  %v1295_v4 = vmul.f32 %v1263_v43, %v3671_v47 }
 0x1be   : > { %v1539_v51 = vadd.f32 1.0, %v1507_v58  ;;  %v1508_v45 = vmul.f32 %v2608_v34, %v3641_v55  ;;  %v1421_v38 = vmul.f32 %v1389_v33, %v3621_v28  ;;  %v1354_v9 = vmul.f32 %v1322_v62, %v3535_v24 }
 0x1bf   : > { %v2610_v42 = vpop.eup %2609  ;;  %v1543_v16 = vadd.f32 1.0, %v1511_v11  ;;  %v1449_v15 = vadd.f32 -0.014264739, %v1417_v63  ;;  %v1358_v59 = vmul.f32 %v1326_v17, %v3647_v37  ;;  %v1323_v56 = vadd.f32 -0.001682827, %v1291_v0 }
 0x1c0   : > { %v1571_v50 = vmul.f32 %v1539_v51, %v4034_v39  ;;  %v1512_v14 = vmul.f32 %v2610_v42, %v3720_v46  ;;  %v1540_v40 = vadd.f32 1.0, %v1508_v45  ;;  %v1453_v49 = vadd.f32 -0.014264739, %v1421_v38  ;;  %v4039_v42 = vld [vmem:[#allocation41_spill] sm:$0xff] }
 0x1c1   : > { %v1575_v18 = vmul.f32 %v1543_v16, %v3570_v19  ;;  %2611 = vrcp.f32 %v1449_v15  ;;  %v1386_v55 = vadd.f32 -0.0073733293, %v1354_v9  ;;  %v1390_v29 = vadd.f32 -0.0073733293, %v1358_v59  ;;  %v4038_v9 = vld [vmem:[#allocation35_spill] sm:$0xff]  ;;  %v4040_v59 = vld [vmem:[#allocation16_spill] sm:$0xff] }
 0x1c2   : > { %v1544_v28 = vadd.f32 1.0, %v1512_v14  ;;  %v1572_v23 = vmul.f32 %v1540_v40, %v4035_v35  ;;  %2613 = vrcp.f32 %v1453_v49  ;;  %v1327_v25 = vadd.f32 -0.001682827, %v1295_v4 }
 0x1c3   : > { %v1595_v13 = vpack.c.bf16 %v1575_v18, %v1571_v50  ;;  %v1418_v52 = vmul.f32 %v1386_v55, %v3535_v24  ;;  %v1422_v54 = vmul.f32 %v1390_v29, %v3647_v37  ;;  %v1355_v22 = vmul.f32 %v1323_v56, %v3574_v20  ;;  %v4041_v50 = vld [vmem:[#allocation48_spill] sm:$0xff] }
 0x1c4   : > { %v1576_v46 = vmul.f32 %v1544_v28, %v3595_v6  ;;  %v1359_v53 = vmul.f32 %v1327_v25, %v3671_v47  ;;  %v1260_v19 = vadd.f32 -0.00021337405, %v1228_v48  ;;  %v1264_v7 = vadd.f32 -0.00021337405, %v1232_v30  ;;  %v4042_v55 = vld [vmem:[#allocation36_spill] sm:$0xff] }
 0x1c5   : > { %v1072_v5 = vmul.f32 %v3748_v44, %v3687_v41  ;;  %1937 = vmatmul.bf16.gmra.mxu2 %v1595_v13  ;;  %v1450_v32 = vadd.f32 -0.014264739, %v1418_v52  ;;  %v1454_v12 = vadd.f32 -0.014264739, %v1422_v54  ;;  %v1387_v1 = vadd.f32 -0.0073733293, %v1355_v22 }
 0x1c6   : > { %v1596_v36 = vpack.c.bf16 %v1576_v46, %v1572_v23  ;;  %v1391_v60 = vadd.f32 -0.0073733293, %v1359_v53  ;;  %v1292_v24 = vmul.f32 %v1260_v19, %v3610_v8  ;;  %v1296_v37 = vmul.f32 %v1264_v7, %v3687_v41  ;;  %v4043_v13 = vld [vmem:[#allocation43_spill] sm:$0xff] }
 0x1c7   : > { %v2612_v31 = vpop.eup %2611  ;;  %v1100_v6 = vadd.f32 -0.0029546001, %v3764_v26  ;;  %v1135_v48 = vmul.f32 %v3751_v61, %v3671_v47  ;;  %2615 = vrcp.f32 %v1450_v32  ;;  %v1419_v57 = vmul.f32 %v1387_v1, %v3574_v20  ;;  %v4045_v1 = vld [vmem:[#allocation42_spill] sm:$0xff] }
 0x1c8   : > { %v2614_v44 = vpop.eup %2613  ;;  %1966 = vmatmul.bf16.gmra.mxu3 %v1596_v36  ;;  %v1513_v43 = vmul.f32 %v2612_v31, %v3723_v21  ;;  %2617 = vrcp.f32 %v1454_v12  ;;  %v1423_v30 = vmul.f32 %v1391_v60, %v3671_v47  ;;  %v1324_v3 = vadd.f32 -0.001682827, %v1292_v24  ;;  %v4046_v60 = vld [vmem:[#allocation45_spill] sm:$0xff] }
 0x1c9   : > { %v1198_v58 = vmul.f32 %v3632_v27, %v3742_v10  ;;  %v1517_v33 = vmul.f32 %v2614_v44, %v3789_v2  ;;  %v1451_v26 = vadd.f32 -0.014264739, %v1419_v57  ;;  %v1328_v62 = vadd.f32 -0.001682827, %v1296_v37  ;;  %v4036_v27 = vld [vmem:[#allocation44_spill] sm:$0xff]  ;;  %v4037_v2 = vld [vmem:[#allocation47_spill] sm:$0xff] }
 0x1ca   : > { %v1104_v0 = vadd.f32 -0.0029546001, %v1072_v5  ;;  %v1545_v61 = vadd.f32 1.0, %v1513_v43  ;;  %v1455_v34 = vadd.f32 -0.014264739, %v1423_v30  ;;  %v1356_v20 = vmul.f32 %v1324_v3, %v3610_v8 }
 0x1cb   : > { %v1167_v11 = vadd.f32 -0.016096033, %v1135_v48  ;;  %v1549_v63 = vadd.f32 1.0, %v1517_v33  ;;  %2619 = vrcp.f32 %v1451_v26  ;;  %v1360_v21 = vmul.f32 %v1328_v62, %v3687_v41  ;;  %v4048_v62 = vld [vmem:[#allocation40_spill] sm:$0xff] }
 0x1cc   : > { %2621 = vrcp.f32 %v1455_v34  ;;  %v1388_v47 = vadd.f32 -0.0073733293, %v1356_v20  ;;  %v1132_v4 = vmul.f32 %v1100_v6, %v3610_v8  ;;  %v1577_v10 = vmul.f32 %v1545_v61, %v4036_v27  ;;  %v4047_v6 = vld [vmem:[#allocation49_spill] sm:$0xff]  ;;  %v4049_v61 = vld [vmem:[#allocation46_spill] sm:$0xff] }
 0x1cd   : > { %v2616_v17 = vpop.eup %2615  ;;  %v1581_v51 = vmul.f32 %v1549_v63, %v4037_v2  ;;  %v1392_v45 = vadd.f32 -0.0073733293, %v1360_v21  ;;  %v1195_v16 = vmul.f32 %v4039_v42, %v4038_v9  ;;  %v1136_v15 = vmul.f32 %v1104_v0, %v3687_v41 }
 0x1ce   : > { %v2618_v38 = vpop.eup %2617  ;;  %v1514_v56 = vmul.f32 %v2616_v17, %v4040_v59  ;;  %v1420_v39 = vmul.f32 %v1388_v47, %v3610_v8  ;;  %v1199_v14 = vmul.f32 %v4041_v50, %v1167_v11  ;;  %v650_v29 = vmul.f32 0.5, %v4042_v55  ;;  %v3891_v47 = vld [vmem:[%s3951_s4] ss:$0 sm:$0xff] }
 0x1cf   : > { %v1597_v40 = vpack.c.bf16 %v1581_v51, %v1577_v10  ;;  %v1518_v49 = vmul.f32 %v2618_v38, %v1198_v58  ;;  %v1424_v18 = vmul.f32 %v1392_v45, %v3687_v41  ;;  %v1164_v25 = vadd.f32 -0.016096033, %v1132_v4  ;;  %v4044_v41 = vld [vmem:[#allocation38_spill] sm:$0xff] }
 0x1d0   : > { %v1546_v28 = vadd.f32 1.0, %v1514_v56  ;;  %v1452_v35 = vadd.f32 -0.014264739, %v1420_v39  ;;  %v654_v52 = vmul.f32 0.5, %v4043_v13  ;;  %v1168_v53 = vadd.f32 -0.016096033, %v1136_v15 }
 0x1d1   : > { %v2620_v23 = vpop.eup %2619  ;;  %1884 = vmatmul.bf16.gmra.mxu0 %v1597_v40  ;;  %v1550_v54 = vadd.f32 1.0, %v1518_v49  ;;  %v1456_v22 = vadd.f32 -0.014264739, %v1424_v18  ;;  %v651_v32 = vmul.f32 0.5, %v4044_v41  ;;  %v1196_v36 = vmul.f32 %v4045_v1, %v1164_v25 }
 0x1d2   : > { %v2622_v46 = vpop.eup %2621  ;;  %v1515_v8 = vmul.f32 %v2620_v23, %v1195_v16  ;;  %2623 = vrcp.f32 %v1452_v35  ;;  %v1578_v19 = vmul.f32 %v1546_v28, %v650_v29  ;;  %v655_v24 = vmul.f32 0.5, %v4046_v60 }
 0x1d3   : > { %v1582_v7 = vmul.f32 %v1550_v54, %v654_v52  ;;  %v1519_v5 = vmul.f32 %v2622_v46, %v1199_v14  ;;  %2625 = vrcp.f32 %v1456_v22  ;;  %v1200_v48 = vmul.f32 %v4047_v6, %v1168_v53 }
 0x1d4   : > { %v1547_v12 = vadd.f32 1.0, %v1515_v8  ;;  %v652_v0 = vmul.f32 0.5, %v4048_v62  ;;  %v656_v34 = vmul.f32 0.5, %v4049_v61 }
 0x1d5   : > { %v1598_v37 = vpack.c.bf16 %v1582_v7, %v1578_v19  ;;  %v1551_v31 = vadd.f32 1.0, %v1519_v5 }
 0x1d6   : > { %v1579_v57 = vmul.f32 %v1547_v12, %v651_v32 }
 0x1d7   : > { %1913 = vmatmul.bf16.gmra.mxu1 %v1598_v37  ;;  %v1583_v44 = vmul.f32 %v1551_v31, %v655_v24  ;;  %v1870_v17 = vpop.f32.mrf.mxu0 }
 0x1d8   : > { %v2624_v43 = vpop.eup %2623  ;;  %v1871_v4 = vadd.f32 %v3891_v47, %v1870_v17 }
 0x1d9   : > { %v2626_v30 = vpop.eup %2625  ;;  %v1599_v3 = vpack.c.bf16 %v1583_v44, %v1579_v57  ;;  %v1516_v58 = vmul.f32 %v2624_v43, %v1196_v36 }
 0x1da   : > { %v1520_v33 = vmul.f32 %v2626_v30, %v1200_v48  ;;  %v1899_v27 = vpop.f32.mrf.mxu1 }
 0x1db   : > { %1942 = vmatmul.bf16.gmra.mxu2 %v1599_v3  ;;  %v1548_v26 = vadd.f32 1.0, %v1516_v58  ;;  %v1900_v10 = vadd.f32 %v1899_v27, %v1871_v4 }
 0x1dc   : > { %v1552_v20 = vadd.f32 1.0, %v1520_v33 }
 0x1dd   : > { %v1580_v11 = vmul.f32 %v1548_v26, %v652_v0 }
 0x1de   : > { %v1584_v63 = vmul.f32 %v1552_v20, %v656_v34 }
 0x1df   : > { %v1872_v9 = vpop.f32.mrf.mxu0 }
 0x1e0   : > { %v1600_v21 = vpack.c.bf16 %v1584_v63, %v1580_v11  ;;  %v1873_v42 = vadd.f32 %v3891_v47, %v1872_v9 }
 0x1e2   : > { %1971 = vmatmul.bf16.gmra.mxu3 %v1600_v21  ;;  %v1901_v16 = vpop.f32.mrf.mxu1 }
 0x1e3   : > { %v1902_v15 = vadd.f32 %v1901_v16, %v1873_v42 }
 0x1f0   : > { %v1928_v2 = vpop.f32.mrf.mxu2 }
 0x1f1   : > { %v1929_v51 = vadd.f32 %v1928_v2, %v1900_v10 }
 0x1f2   : > { %v1957_v45 = vpop.f32.mrf.mxu3 }
 0x1f3   : > { %v1958_v38 = vadd.f32 %v1957_v45, %v1929_v51 }
 0x1f5   : > { %1977 = vst [vmem:[%s3896_s16] sm:$0xff] %v1958_v38 }
 0x1f8   : > { %v1930_v59 = vpop.f32.mrf.mxu2 }
 0x1f9   : > { %v1931_v56 = vadd.f32 %v1930_v59, %v1902_v15 }
 0x1fa   : > { %v1959_v39 = vpop.f32.mrf.mxu3 }
 0x1fb   : > { %v1960_v50 = vadd.f32 %v1959_v39, %v1931_v56 }
 0x1fd   : > { %1978 = vst [vmem:[%s3896_s16 + $0x8] sm:$0xff] %v1960_v50 }
 0x215   : > { %v1875_v14 = vpop.f32.mrf.mxu0 }
 0x216   : > { %v1876_v40 = vadd.f32 %v3891_v47, %v1875_v14 }
 0x21d   : > { %v1877_v29 = vpop.f32.mrf.mxu0 }
 0x21e   : > { %v1878_v35 = vadd.f32 %v3891_v47, %v1877_v29 }
 0x221   : > { %v1904_v49 = vpop.f32.mrf.mxu1 }
 0x222   : > { %v1905_v55 = vadd.f32 %v1904_v49, %v1876_v40 }
 0x229   : > { %v1906_v13 = vpop.f32.mrf.mxu1 }
 0x22a   : > { %v1907_v54 = vadd.f32 %v1906_v13, %v1878_v35 }
 0x22d   : > { %v1933_v18 = vpop.f32.mrf.mxu2 }
 0x22e   : > { %v1934_v28 = vadd.f32 %v1933_v18, %v1905_v55 }
 0x233   : > { %v1880_v53 = vpop.f32.mrf.mxu0 }
 0x234   : > { %v1881_v19 = vadd.f32 %v3891_v47, %v1880_v53 }
 0x235   : > { %v1962_v23 = vpop.f32.mrf.mxu3  ;;  %v1935_v52 = vpop.f32.mrf.mxu2 }
 0x236   : > { %v1963_v25 = vadd.f32 %v1962_v23, %v1934_v28  ;;  %v1936_v22 = vadd.f32 %v1935_v52, %v1907_v54 }
 0x237   : > { %v1909_v7 = vpop.f32.mrf.mxu1 }
 0x238   : > { %1979 = vst [vmem:[%s3896_s16 + $0x10] sm:$0xff] %v1963_v25  ;;  %v1910_v5 = vadd.f32 %v1909_v7, %v1881_v19 }
 0x23b   : > { %v1882_v41 = vpop.f32.mrf.mxu0 }
 0x23c   : > { %v1883_v1 = vadd.f32 %v3891_v47, %v1882_v41 }
 0x23d   : > { %v1964_v46 = vpop.f32.mrf.mxu3 }
 0x23e   : > { %v1965_v8 = vadd.f32 %v1964_v46, %v1936_v22 }
 0x23f   : > { %v1911_v24 = vpop.f32.mrf.mxu1 }
 0x240   : > { %1980 = vst [vmem:[%s3896_s16 + $0x18] sm:$0xff] %v1965_v8  ;;  %v1912_v37 = vadd.f32 %v1911_v24, %v1883_v1 }
 0x248   : > { %v1938_v32 = vpop.f32.mrf.mxu2 }
 0x249   : > { %v1939_v12 = vadd.f32 %v1938_v32, %v1910_v5 }
 0x24b   : > { %v1967_v36 = vpop.f32.mrf.mxu3 }
 0x24c   : > { %v1968_v60 = vadd.f32 %v1967_v36, %v1939_v12 }
 0x24e   : > { %1981 = vst [vmem:[%s3896_s16 + $0x20] sm:$0xff] %v1968_v60  ;;  %v1885_v44 = vpop.f32.mrf.mxu0 }
 0x24f   : > { %v1886_v43 = vadd.f32 %v3891_v47, %v1885_v44 }
 0x250   : > { %v1940_v31 = vpop.f32.mrf.mxu2 }
 0x251   : > { %v1941_v6 = vadd.f32 %v1940_v31, %v1912_v37 }
 0x253   : > { %v1969_v48 = vpop.f32.mrf.mxu3 }
 0x254   : > { %v1970_v57 = vadd.f32 %v1969_v48, %v1941_v6  ;;  %v1914_v30 = vpop.f32.mrf.mxu1 }
 0x255   : > { %v1915_v58 = vadd.f32 %v1914_v30, %v1886_v43 }
 0x256   : > { %1982 = vst [vmem:[%s3896_s16 + $0x28] sm:$0xff] %v1970_v57  ;;  %v1887_v33 = vpop.f32.mrf.mxu0 }
 0x257   : > { %v1888_v62 = vadd.f32 %v3891_v47, %v1887_v33 }
 0x25c   : > { %v1916_v34 = vpop.f32.mrf.mxu1 }
 0x25d   : > { %v1917_v11 = vadd.f32 %v1916_v34, %v1888_v62 }
 0x25e   : > { %v1943_v3 = vpop.f32.mrf.mxu2 }
 0x25f   : > { %v1944_v26 = vadd.f32 %v1943_v3, %v1915_v58 }
 0x265   : > { %v1972_v0 = vpop.f32.mrf.mxu3 }
 0x266   : > { %v1973_v61 = vadd.f32 %v1972_v0, %v1944_v26  ;;  %v1945_v20 = vpop.f32.mrf.mxu2 }
 0x267   : > { %v1946_v63 = vadd.f32 %v1945_v20, %v1917_v11 }
 0x268   : > { %1983 = vst [vmem:[%s3896_s16 + $0x30] sm:$0xff] %v1973_v61 }
 0x26d   : > { %v1974_v21 = vpop.f32.mrf.mxu3 }
 0x26e   : > { %v1975_v47 = vadd.f32 %v1974_v21, %v1946_v63 }
 0x270   : > { %1984 = vst [vmem:[%s3896_s16 + $0x38] sm:$0xff] %v1975_v47 }
 0x271   : > { %2774 = shalt.err (!%p2771_p10)
}
 0x272   : > { %s2832_s17 = smov 128   ;;  %s2833_s29 = smov 8  }
 0x273   : > { %2491 = dma.vmem_to_hbm [thread:$0]  (%p2947_p7), %s1999_s12, 1024, %s2001_s13, %s1986_s14, %s2832_s17, %s2832_s17, %s2833_s29  }
 0x274 PF: > { %s2015_s16 = sand.u32 1, %s2809_s18   ;;  %p4050_p12 = scmp.ge.s32.totalorder %s2821_s21, 2 }
 0x275   : > { %s2016_s23 = scalar_lea.sflag [#allocation4], %s2015_s16 }
 0x276   : > { %p2508_p13 = pnand %p4050_p12, %p2899_p6 }
 0x278   : > { %p2509_p0 = pneg %p2508_p13 }
 0x27a   : > { %2804 = dma.done.wait (%p2509_p0), %s2016_s23, 1024  }
 0x27b   : > { %2806 = vsyncadd (%p2509_p0), %s2016_s23, 4294966272  ;;  %p20_p3 = scmp.ge.s32.totalorder %s2933_s30, 4   ;;  %s4051_s18 = smov %s2813_s19 }
 0x27c   : > { %s4052_s19 = smov %s2817_s20  ;;  %s4053_s20 = smov %s2943_s9 }
 0x27d   : > { %s4054_s21 = smov %s2933_s30  ;;  %22 = sbr.rel (!%p20_p3) target bundleno = 7 (0x7), region = 97 }
 0x282   :  { %2022 = vsyncpa [#allocation3], 1 }
 0x283   :  { %2024 = vsyncpa [#allocation3 + $0x1], 1 }
 0x284   :  { %2025 = vsyncpa [#allocation6], 1 }
 0x285   :  { %2026 = vsyncpa [#allocation9], 1 }
 0x286   :  { %2027 = vsyncpa [#allocation4], 1 }
 0x287   :  { %2029 = vsyncpa [#allocation4 + $0x1], 1 }

</bundles_post_ra>
